<compile_context>
chip_gen: v5e
topology: v5e:2x2
jax: 0.10.0
libtpu: 0.0.40
codegen_flags: <defaults>
</compile_context>

<pallas_src>
import jax
import jax.numpy as jnp
from jax.experimental import pallas as pl
from jax.experimental.pallas import tpu as pltpu


# --------------------------------- fused SE kernel ---------------------------------------
def _se_block_kernel(x_ref, w1f_ref, w2b_ref, o_ref):
    # x_ref:   (Nb, H, W*C)  lane-dense per-step view
    # w1f_ref: (W*C, Cr)     = pool-matrix @ Linear1.weight.T   (mean fold pre-applied)
    # w2b_ref: (Cr, W*C)     = Linear2.weight.T @ bcast-matrix  (channel->lane broadcast pre-applied)
    # o_ref:   (Nb, H, W*C)
    x = x_ref[...]                                                        # (Nb, H, W*C)

    # Sum over H (sublane reduce); the 1/(H*W) scaling and the W*C -> C channel fold are
    # baked into w1f, so a single MXU dot yields the post-first-Linear activations.
    col = jnp.sum(x, axis=1)                                              # (Nb, W*C)
    z = jnp.maximum(
        jnp.dot(col, w1f_ref[...], preferred_element_type=jnp.float32), 0.0)   # (Nb, Cr)

    # Second Linear with the C -> W*C broadcast baked in, then sigmoid (elementwise, so it
    # commutes with the 0/1 selector fold).  Result is already in the lane-dense layout.
    z = jnp.dot(z, w2b_ref[...], preferred_element_type=jnp.float32)      # (Nb, W*C)
    scale = jax.nn.sigmoid(z)                                             # (Nb, W*C)

    o_ref[...] = (x * scale[:, None, :]).astype(o_ref.dtype)              # broadcast over H


def _grid_steps(n_batch: int) -> int:
    """1 step on single-TC chips (v5e/v6e), 2 'parallel' steps on dual-TC v7x."""
    try:
        kind = jax.devices()[0].device_kind.lower()
    except Exception:
        kind = ""
    n_cores = 2 if ("v7" in kind or "7x" in kind) else 1
    steps = max(1, min(n_batch, n_cores))
    while n_batch % steps:
        steps -= 1
    return steps


def se_block_forward(x_nhwc, w1, w2):
    """SE block forward. x_nhwc: (N, H, W, C) f32; w1 = W1.T: (C, C//r); w2 = W2.T: (C//r, C)."""
    N, H, W, C = x_nhwc.shape
    Cr = w1.shape[1]
    WC = W * C

    # Host-side fold of the mean / broadcast matrices into the weights (constant under jit).
    eye_c = jnp.eye(C, dtype=jnp.float32)
    pool = jnp.tile(eye_c, (W, 1)) * (1.0 / float(H * W))                 # (W*C, C)
    bcast = jnp.tile(eye_c, (1, W))                                       # (C, W*C)
    w1f = (pool @ w1.astype(jnp.float32)).astype(x_nhwc.dtype)            # (W*C, Cr)
    w2b = (w2.astype(jnp.float32) @ bcast).astype(x_nhwc.dtype)           # (Cr, W*C)

    x2 = x_nhwc.reshape(N, H, WC)                                         # free reshape

    steps = _grid_steps(N)
    Nb = N // steps

    out2 = pl.pallas_call(
        _se_block_kernel,
        out_shape=jax.ShapeDtypeStruct((N, H, WC), x_nhwc.dtype),
        grid=(steps,),
        in_specs=[
            pl.BlockSpec((Nb, H, WC), lambda n: (n, 0, 0)),
            pl.BlockSpec((WC, Cr), lambda n: (0, 0)),
            pl.BlockSpec((Cr, WC), lambda n: (0, 0)),
        ],
        out_specs=pl.BlockSpec((Nb, H, WC), lambda n: (n, 0, 0)),
        compiler_params=pltpu.CompilerParams(
            dimension_semantics=("parallel",),          # batch steps across TCs on v7x
            vmem_limit_bytes=32 * 1024 * 1024,          # fits all of v5e/v6e/v7x at these sizes
        ),
    )(x2, w1f, w2b)

    return out2.reshape(N, H, W, C)                                       # free reshape


# -------------------------------- pure-JAX reference -------------------------------------
def reference_forward(x_nhwc, w1, w2):
    m = jnp.mean(x_nhwc, axis=(1, 2))                                     # (N, C)
    s = jax.nn.sigmoid(jnp.maximum(m @ w1, 0.0) @ w2)                     # (N, C)
    return x_nhwc * s[:, None, None, :]


if __name__ == "__main__":
    # in_channels = 32, ratio = 16 -> bottleneck = 2; spatial 16x16, batch 2.
    N, C, H, W = 2, 32, 16, 16
    ratio = 16
    Cr = C // ratio

    key = jax.random.PRNGKey(0)
    k_w1, k_w2, k_x = jax.random.split(key, 3)

    # PyTorch-native Linear weights (out_features, in_features), no bias.
    se_w1_pt = jax.random.normal(k_w1, (Cr, C), jnp.float32) * 0.3        # Linear(C, C//r)
    se_w2_pt = jax.random.normal(k_w2, (C, Cr), jnp.float32) * 0.3        # Linear(C//r, C)
    w1 = se_w1_pt.T                                                       # (C, Cr)
    w2 = se_w2_pt.T                                                       # (Cr, C)

    # Input in NHWC (PyTorch NCHW transposed to channel-last for TPU).
    x = jax.random.normal(k_x, (N, H, W, C), jnp.float32)

    out = jax.jit(se_block_forward)(x, w1, w2)
    out = jax.block_until_ready(out)

    ref = reference_forward(x, w1, w2)
    assert out.shape == (N, H, W, C)
    err = float(jnp.max(jnp.abs(out - ref)))
    scale = float(jnp.max(jnp.abs(ref))) + 1e-6
    assert err / scale < 1e-2, f"mismatch: max abs err {err}, rel {err / scale}"
    print("KERNEL_OK")
</pallas_src>

<mosaic_0001>
module attributes {stable_mosaic.version = 11 : i64} {
  func.func @_se_block_kernel(%arg0: i32, %arg1: memref<2x16x512xf32, #tpu.memory_space<vmem>>, %arg2: memref<512x2xf32, #tpu.memory_space<vmem>>, %arg3: memref<2x512xf32, #tpu.memory_space<vmem>>, %arg4: memref<2x16x512xf32, #tpu.memory_space<vmem>>) attributes {dimension_semantics = [#tpu.dimension_semantics<parallel>], iteration_bounds = array<i64: 1>, scalar_prefetch = 0 : i64, scratch_operands = 0 : i64, tpu.core_type = #tpu.core_type<tc>, window_params = [{transform_indices = @transform_0, window_bounds = array<i64: 2, 16, 512>}, {pipeline_mode = #tpu.pipeline_mode<synchronous>, transform_indices = @transform_1, window_bounds = array<i64: 512, 2>}, {pipeline_mode = #tpu.pipeline_mode<synchronous>, transform_indices = @transform_2, window_bounds = array<i64: 2, 512>}, {transform_indices = @transform_3, window_bounds = array<i64: 2, 16, 512>}]} {
    %c0 = arith.constant 0 : index
    %c0_0 = arith.constant 0 : index
    %c0_1 = arith.constant 0 : index
    %0 = vector.load %arg1[%c0, %c0_0, %c0_1] : memref<2x16x512xf32, #tpu.memory_space<vmem>>, vector<2x16x512xf32>
    %cst = arith.constant dense<0.000000e+00> : vector<2x512xf32>
    %1 = vector.multi_reduction <add>, %0, %cst [1] : vector<2x16x512xf32> to vector<2x512xf32>
    %c0_2 = arith.constant 0 : index
    %c0_3 = arith.constant 0 : index
    %2 = vector.load %arg2[%c0_2, %c0_3] : memref<512x2xf32, #tpu.memory_space<vmem>>, vector<512x2xf32>
    %cst_4 = arith.constant dense<0.000000e+00> : vector<2x2xf32>
    %3 = tpu.matmul %1, %2, %cst_4 {dimension_numbers = #tpu.dot_dimension_numbers<[1], [0], [0], [1], [0, 0, 1, 1], [], []>} : vector<2x512xf32>, vector<512x2xf32>, vector<2x2xf32> -> vector<2x2xf32>
    %cst_5 = arith.constant 0.000000e+00 : f32
    %4 = vector.broadcast %cst_5 : f32 to vector<2x2xf32>
    %5 = arith.maximumf %3, %4 : vector<2x2xf32>
    %c0_6 = arith.constant 0 : index
    %c0_7 = arith.constant 0 : index
    %6 = vector.load %arg3[%c0_6, %c0_7] : memref<2x512xf32, #tpu.memory_space<vmem>>, vector<2x512xf32>
    %cst_8 = arith.constant dense<0.000000e+00> : vector<2x512xf32>
    %7 = tpu.matmul %5, %6, %cst_8 {dimension_numbers = #tpu.dot_dimension_numbers<[1], [0], [0], [1], [0, 0, 1, 1], [], []>} : vector<2x2xf32>, vector<2x512xf32>, vector<2x512xf32> -> vector<2x512xf32>
    %8 = arith.negf %7 : vector<2x512xf32>
    %9 = math.exp %8 : vector<2x512xf32>
    %cst_9 = arith.constant 1.000000e+00 : f32
    %10 = vector.broadcast %cst_9 : f32 to vector<2x512xf32>
    %11 = arith.addf %10, %9 : vector<2x512xf32>
    %12 = arith.divf %10, %11 : vector<2x512xf32>
    %13 = vector.shape_cast %12 : vector<2x512xf32> to vector<2x1x512xf32>
    %14 = vector.broadcast %13 : vector<2x1x512xf32> to vector<2x16x512xf32>
    %15 = arith.mulf %0, %14 : vector<2x16x512xf32>
    %c0_10 = arith.constant 0 : index
    %c0_11 = arith.constant 0 : index
    %c0_12 = arith.constant 0 : index
    %16 = vector.load %arg4[%c0_10, %c0_11, %c0_12] : memref<2x16x512xf32, #tpu.memory_space<vmem>>, vector<2x16x512xf32>
    tpu.vector_store %arg4[%c0_10, %c0_11, %c0_12], %15 {strides = array<i32>} : memref<2x16x512xf32, #tpu.memory_space<vmem>>, vector<2x16x512xf32>,
    return
  }
  func.func @transform_0(%arg0: i32) -> (i32, i32, i32) {
    %c0_i32 = arith.constant 0 : i32
    %c0_i32_0 = arith.constant 0 : i32
    %c0_i32_1 = arith.constant 0 : i32
    return %arg0, %c0_i32, %c0_i32_0 : i32, i32, i32
  }
  func.func @transform_1(%arg0: i32) -> (i32, i32) {
    %c0_i32 = arith.constant 0 : i32
    %c0_i32_0 = arith.constant 0 : i32
    %c0_i32_1 = arith.constant 0 : i32
    return %c0_i32, %c0_i32_0 : i32, i32
  }
  func.func @transform_2(%arg0: i32) -> (i32, i32) {
    %c0_i32 = arith.constant 0 : i32
    %c0_i32_0 = arith.constant 0 : i32
    %c0_i32_1 = arith.constant 0 : i32
    return %c0_i32, %c0_i32_0 : i32, i32
  }
  func.func @transform_3(%arg0: i32) -> (i32, i32, i32) {
    %c0_i32 = arith.constant 0 : i32
    %c0_i32_0 = arith.constant 0 : i32
    %c0_i32_1 = arith.constant 0 : i32
    return %arg0, %c0_i32, %c0_i32_0 : i32, i32, i32
  }
}

</mosaic_0001>

<bundles_post_ra>
// kernel: tile.19
= control target key start
LH: loop header
LB: loop body
LE: loop exit
PB: predicated region body
PF: predicated region fallthrough
CT: control target
= control target key end

     0   :  { %s3495_s0 = inlined_call_operand.vmem [shape: bf16[32,16,32], index: 0, kind: input, shape index: {}]   ;;  %s3496_s1 = inlined_call_operand.vmem [shape: bf16[32,512], index: 1, kind: output, shape index: {}]  }
   0x1   :  { %3500 = sst [smem:[#allocation14_spill]] %s3496_s1 }
   0x2   :  { %v2708_v0 = vld [vmem:[%s3495_s0 + $0x78] sm:$0xff]   ;;  %v2713_v1 = vld [vmem:[%s3495_s0 + $0x70] sm:$0xff]   ;;  %v2718_v2 = vld [vmem:[%s3495_s0 + $0x68] sm:$0xff]   ;;  %s1187_s11 = smov 3  ;;  %s1190_s12 = smov 12  ;;  %vm1078_vm0 = vcmask 1043458  }
   0x3   :  { %v2429_v3 = vunpack.c.l.bf16 %v2708_v0  ;;  %v2433_v4 = vunpack.c.l.bf16 %v2713_v1  ;;  %v2437_v5 = vunpack.c.l.bf16 %v2718_v2  ;;  %v2726_v6 = vld [vmem:[%s3495_s0 + $0x60] sm:$0xff]   ;;  %v2731_v7 = vld [vmem:[%s3495_s0 + $0x58] sm:$0xff]   ;;  %v2736_v8 = vld [vmem:[%s3495_s0 + $0x50] sm:$0xff]   ;;  %s2811_s15 = smov 3  ;;  %s1195_s16 = smov 48  ;;  %vm1083_vm1 = vcmask 1045508  }
   0x4   :  { %v2441_v9 = vunpack.c.l.bf16 %v2726_v6  ;;  %v2742_v10 = vld [vmem:[%s3495_s0 + $0x48] sm:$0xff]   ;;  %v2445_v11 = vunpack.c.l.bf16 %v2731_v7  ;;  %v2748_v12 = vld [vmem:[%s3495_s0 + $0x40] sm:$0xff]   ;;  %v2449_v13 = vunpack.c.l.bf16 %v2736_v8  ;;  %v2754_v14 = vld [vmem:[%s3495_s0 + $0x38] sm:$0xff]   ;;  %s1095_s19 = smov 3  ;;  %s1098_s20 = smov 12  ;;  %vm1088_vm2 = vcmask 1047558  }
   0x5   :  { %513 = vst [vmem:[#allocation1 + $0xf0] sm:$0xff] %v2429_v3  ;;  %v2453_v15 = vunpack.c.l.bf16 %v2742_v10  ;;  %v2760_v16 = vld [vmem:[%s3495_s0 + $0x30] sm:$0xff]   ;;  %v2457_v17 = vunpack.c.l.bf16 %v2748_v12  ;;  %v2766_v18 = vld [vmem:[%s3495_s0 + $0x28] sm:$0xff]   ;;  %v2461_v19 = vunpack.c.l.bf16 %v2754_v14  ;;  %v2772_v20 = vld [vmem:[%s3495_s0 + $0x20] sm:$0xff]   ;;  %s2830_s25 = smov 12  ;;  %s1103_s26 = smov 48  ;;  %v2430_v0 = vunpack.c.h.bf16 %v2708_v0 }
   0x6   :  { %543 = vst [vmem:[#allocation1 + $0xe0] sm:$0xff] %v2433_v4  ;;  %v2465_v21 = vunpack.c.l.bf16 %v2760_v16  ;;  %v2778_v22 = vld [vmem:[%s3495_s0 + $0x18] sm:$0xff]   ;;  %v2469_v23 = vunpack.c.l.bf16 %v2766_v18  ;;  %v2784_v24 = vld [vmem:[%s3495_s0 + $0x10] sm:$0xff]   ;;  %v2473_v25 = vunpack.c.l.bf16 %v2772_v20  ;;  %v2790_v26 = vld [vmem:[%s3495_s0 + $0x8] sm:$0xff]   ;;  %s2833_s27 = smov 48  ;;  %s2835_s28 = smov 192  ;;  %v2434_v1 = vunpack.c.h.bf16 %v2713_v1 }
   0x7   :  { %573 = vst [vmem:[#allocation1 + $0xd0] sm:$0xff] %v2437_v5  ;;  %v2477_v27 = vunpack.c.l.bf16 %v2778_v22  ;;  %v2796_v28 = vld [vmem:[%s3495_s0] sm:$0xff]   ;;  %v2481_v29 = vunpack.c.l.bf16 %v2784_v24  ;;  %v2485_v30 = vunpack.c.l.bf16 %v2790_v26  ;;  %v2803_v31 = vld [vmem:[%s3495_s0 + $0xf8] sm:$0xff]   ;;  %v2809_v33 = vld [vmem:[%s3495_s0 + $0xf0] sm:$0xff]   ;;  %s1200_s29 = smov 192  ;;  %s2839_s30 = smov 3  ;;  %v2438_v2 = vunpack.c.h.bf16 %v2718_v2 }
   0x8   :  { %603 = vst [vmem:[#allocation1 + $0xc0] sm:$0xff] %v2441_v9  ;;  %v2489_v32 = vunpack.c.l.bf16 %v2796_v28  ;;  %v2816_v34 = vld [vmem:[%s3495_s0 + $0xe8] sm:$0xff]   ;;  %v2365_v35 = vunpack.c.l.bf16 %v2803_v31  ;;  %v2822_v36 = vld [vmem:[%s3495_s0 + $0xe0] sm:$0xff]   ;;  %v2369_v39 = vunpack.c.l.bf16 %v2809_v33  ;;  %v2828_v40 = vld [vmem:[%s3495_s0 + $0xd8] sm:$0xff]   ;;  %s2847_s4 = smov 12  ;;  %s1108_s5 = smov 192  ;;  %v2366_v31 = vunpack.c.h.bf16 %v2803_v31 }
   0x9   :  { %633 = vst [vmem:[#allocation1 + $0xb0] sm:$0xff] %v2445_v11  ;;  %v2373_v41 = vunpack.c.l.bf16 %v2816_v34  ;;  %v2377_v44 = vunpack.c.l.bf16 %v2822_v36  ;;  %v2381_v47 = vunpack.c.l.bf16 %v2828_v40  ;;  %v2845_v48 = vld [vmem:[%s3495_s0 + $0xd0] sm:$0xff]   ;;  %v2853_v51 = vld [vmem:[%s3495_s0 + $0xc8] sm:$0xff]   ;;  %s2855_s8 = smov 48  ;;  %s2857_s9 = smov 192  ;;  %v2862_v52 = vld [vmem:[%s3495_s0 + $0xc0] sm:$0xff]   ;;  %v2370_v33 = vunpack.c.h.bf16 %v2809_v33 }
   0xa   :  { %663 = vst [vmem:[#allocation1 + $0xa0] sm:$0xff] %v2449_v13  ;;  %v2867_v53 = vld [vmem:[%s3495_s0 + $0xb8] sm:$0xff]   ;;  %v2385_v56 = vunpack.c.l.bf16 %v2845_v48  ;;  %v2874_v57 = vld [vmem:[%s3495_s0 + $0xb0] sm:$0xff]   ;;  %v2879_v58 = vld [vmem:[%s3495_s0 + $0xa8] sm:$0xff]   ;;  %v2389_v61 = vunpack.c.l.bf16 %v2853_v51  ;;  %s2890_s22 = smov 12  ;;  %s2892_s23 = smov 48  ;;  %v2393_v5 = vunpack.c.l.bf16 %v2862_v52  ;;  %v2374_v34 = vunpack.c.h.bf16 %v2816_v34 }
   0xb   :  { %693 = vst [vmem:[#allocation1 + $0x90] sm:$0xff] %v2453_v15  ;;  %v2888_v62 = vld [vmem:[%s3495_s0 + $0xa0] sm:$0xff]   ;;  %v2901_v9 = vld [vmem:[%s3495_s0 + $0x98] sm:$0xff]   ;;  %s2936_s3 = smov 48  ;;  %s2948_s7 = smov 12  ;;  %v2378_v36 = vunpack.c.h.bf16 %v2822_v36  ;;  %v2382_v40 = vunpack.c.h.bf16 %v2828_v40  ;;  %v2386_v48 = vunpack.c.h.bf16 %v2845_v48  ;;  %v2390_v51 = vunpack.c.h.bf16 %v2853_v51 }
   0xc   :  { %723 = vst [vmem:[#allocation1 + $0x80] sm:$0xff] %v2457_v17  ;;  %s2954_s10 = smov 192  ;;  %s1149_s13 = smov 48  ;;  %v2394_v52 = vunpack.c.h.bf16 %v2862_v52  ;;  %v2442_v6 = vunpack.c.h.bf16 %v2726_v6  ;;  %v2446_v7 = vunpack.c.h.bf16 %v2731_v7  ;;  %v2450_v8 = vunpack.c.h.bf16 %v2736_v8 }
   0xd   :  { %753 = vst [vmem:[#allocation1 + $0x70] sm:$0xff] %v2461_v19  ;;  %s2959_s14 = smov 192  ;;  %s2963_s17 = smov 12  ;;  %v2454_v10 = vunpack.c.h.bf16 %v2742_v10  ;;  %v2458_v12 = vunpack.c.h.bf16 %v2748_v12  ;;  %v2462_v14 = vunpack.c.h.bf16 %v2754_v14  ;;  %v2466_v16 = vunpack.c.h.bf16 %v2760_v16 }
   0xe   :  { %783 = vst [vmem:[#allocation1 + $0x60] sm:$0xff] %v2465_v21  ;;  %v2397_v21 = vunpack.c.l.bf16 %v2867_v53  ;;  %s2966_s18 = smov 48  ;;  %s2973_s21 = smov 3  ;;  %v2398_v53 = vunpack.c.h.bf16 %v2867_v53  ;;  %v2470_v18 = vunpack.c.h.bf16 %v2766_v18  ;;  %v2474_v20 = vunpack.c.h.bf16 %v2772_v20 }
   0xf   :  { %813 = vst [vmem:[#allocation1 + $0x50] sm:$0xff] %v2469_v23  ;;  %s2978_s24 = smov 48  ;;  %s2995_s2 = smov 3  ;;  %v2478_v22 = vunpack.c.h.bf16 %v2778_v22  ;;  %v2482_v24 = vunpack.c.h.bf16 %v2784_v24  ;;  %v2486_v26 = vunpack.c.h.bf16 %v2790_v26  ;;  %v2490_v28 = vunpack.c.h.bf16 %v2796_v28 }
  0x10   :  { %843 = vst [vmem:[#allocation1 + $0x40] sm:$0xff] %v2473_v25  ;;  %s3006_s6 = smov 3  ;;  %s3064_s1 = smov 48  ;;  %vm963_vm3 = vcmask 261120   ;;  %vm1092_vm4 = vcmask 1048320   ;;  %vm1459_vm5 = vcmask 785920  }
  0x11   :  { %873 = vst [vmem:[#allocation1 + $0x30] sm:$0xff] %v2477_v27  ;;  %3503 = sst [smem:[#allocation4_spill]] %s3006_s6  ;;  %s3074_s6 = smov 48  ;;  %vm1826_vm6 = vcmask 523520  }
  0x12   :  { %903 = vst [vmem:[#allocation1 + $0x20] sm:$0xff] %v2481_v29 }
  0x13   :  { %933 = vst [vmem:[#allocation1 + $0x10] sm:$0xff] %v2485_v30  ;;  %v1188_v37 = vld [vmem:[#allocation1 + $0x87] ss:$16 sm:%s1187_s11]   ;;  %v1096_v42 = vld [vmem:[#allocation1 + $0x83] ss:$16 sm:%s1095_s19]   ;;  %s2881_s19 = smov 3 }
  0x14   :  { %v1191_v38 = vld [vmem:[#allocation1 + $0x87] ss:$16 sm:%s1190_s12]   ;;  %961 = vst [vmem:[#allocation1] sm:$0xff] %v2489_v32  ;;  %v1099_v43 = vld [vmem:[#allocation1 + $0x83] ss:$16 sm:%s1098_s20]   ;;  %v2401_v32 = vunpack.c.l.bf16 %v2874_v57  ;;  %s1141_s11 = smov 3  ;;  %v2402_v57 = vunpack.c.h.bf16 %v2874_v57 }
  0x15   :  { %v1193_v45 = vsel %vm1078_vm0, %v1191_v38, %v1188_v37  ;;  %v1196_v46 = vld [vmem:[#allocation1 + $0x87] ss:$16 sm:%s1195_s16]   ;;  %33 = vst [vmem:[#allocation1 + $0x1f0] sm:$0xff] %v2365_v35  ;;  %v1101_v49 = vsel %vm1078_vm0, %v1099_v43, %v1096_v42  ;;  %v1104_v50 = vld [vmem:[#allocation1 + $0x83] ss:$16 sm:%s1103_s26]   ;;  %v2405_v38 = vunpack.c.l.bf16 %v2879_v58  ;;  %v2409_v43 = vunpack.c.l.bf16 %v2888_v62  ;;  %s1144_s12 = smov 12 }
  0x16   :  { %63 = vst [vmem:[#allocation1 + $0x1e0] sm:$0xff] %v2369_v39  ;;  %v1198_v54 = vsel %vm1083_vm1, %v1196_v46, %v1193_v45  ;;  %v1201_v55 = vld [vmem:[#allocation1 + $0x87] ss:$16 sm:%s1200_s29]   ;;  %v1106_v59 = vsel %vm1083_vm1, %v1104_v50, %v1101_v49  ;;  %v1109_v60 = vld [vmem:[#allocation1 + $0x83] ss:$16 sm:%s1108_s5]   ;;  %s2927_s29 = smov 12  ;;  %v2413_v46 = vunpack.c.l.bf16 %v2901_v9  ;;  %v2406_v58 = vunpack.c.h.bf16 %v2879_v58 }
  0x17   :  { %93 = vst [vmem:[#allocation1 + $0x1d0] sm:$0xff] %v2373_v41  ;;  %v1203_v15 = vsel %vm1088_vm2, %v1201_v55, %v1198_v54  ;;  %v1111_v30 = vsel %vm1088_vm2, %v1109_v60, %v1106_v59  ;;  %v2923_v39 = vld [vmem:[%s3495_s0 + $0x90] sm:$0xff]   ;;  %s2961_s16 = smov 3  ;;  %s2968_s20 = smov 192  ;;  %v2410_v62 = vunpack.c.h.bf16 %v2888_v62  ;;  %v2414_v9 = vunpack.c.h.bf16 %v2901_v9 }
  0x18   :  { %123 = vst [vmem:[#allocation1 + $0x1c0] sm:$0xff] %v2377_v44  ;;  %v2934_v44 = vld [vmem:[%s3495_s0 + $0x88] sm:$0xff]   ;;  %v2417_v49 = vunpack.c.l.bf16 %v2923_v39  ;;  %s2981_s26 = smov 192  ;;  %s2999_s5 = smov 48  ;;  %v2418_v39 = vunpack.c.h.bf16 %v2923_v39 }
  0x19   :  { %153 = vst [vmem:[#allocation1 + $0x1b0] sm:$0xff] %v2381_v47  ;;  %v2944_v47 = vld [vmem:[%s3495_s0 + $0x80] sm:$0xff]   ;;  %s2946_s0 = smov 3  ;;  %v2421_v50 = vunpack.c.l.bf16 %v2934_v44  ;;  %v2422_v44 = vunpack.c.h.bf16 %v2934_v44 }
  0x1a   :  { %183 = vst [vmem:[#allocation1 + $0x1a0] sm:$0xff] %v2385_v56  ;;  %v2425_v54 = vunpack.c.l.bf16 %v2944_v47  ;;  %v2426_v47 = vunpack.c.h.bf16 %v2944_v47 }
  0x1b   :  { %v1165_v63 = vld [vmem:[#allocation1 + $0x7] ss:$16 sm:%s2811_s15]   ;;  %v1074_v17 = vld [vmem:[#allocation1 + $0x3] ss:$16 sm:%s2839_s30]   ;;  %213 = vst [vmem:[#allocation1 + $0x190] sm:$0xff] %v2389_v61  ;;  %s2976_s15 = smov 12 }
  0x1c   :  { %v1168_v3 = vld [vmem:[#allocation1 + $0x7] ss:$16 sm:%s2830_s25]   ;;  %v1077_v19 = vld [vmem:[#allocation1 + $0x3] ss:$16 sm:%s2847_s4]   ;;  %s2915_s25 = smov 192  ;;  %243 = vst [vmem:[#allocation1 + $0x180] sm:$0xff] %v2393_v5 }
  0x1d   :  { %v1173_v4 = vld [vmem:[#allocation1 + $0x7] ss:$16 sm:%s2833_s27]   ;;  %v1170_v11 = vsel %vm1078_vm0, %v1168_v3, %v1165_v63  ;;  %v1079_v25 = vsel %vm1078_vm0, %v1077_v19, %v1074_v17  ;;  %v1082_v27 = vld [vmem:[#allocation1 + $0x3] ss:$16 sm:%s2855_s8]   ;;  %s2938_s4 = smov 192  ;;  %273 = vst [vmem:[#allocation1 + $0x170] sm:$0xff] %v2397_v21 }
  0x1e   :  { %v1178_v13 = vld [vmem:[#allocation1 + $0x7] ss:$16 sm:%s2835_s28]   ;;  %v1175_v23 = vsel %vm1083_vm1, %v1173_v4, %v1170_v11  ;;  %v1087_v29 = vld [vmem:[#allocation1 + $0x3] ss:$16 sm:%s2857_s9]   ;;  %v1084_v37 = vsel %vm1083_vm1, %v1082_v27, %v1079_v25  ;;  %s2925_s28 = smov 3  ;;  %s3497_s8 = smov 96  }
  0x1f   :  { %v1180_v35 = vsel %vm1088_vm2, %v1178_v13, %v1175_v23  ;;  %v1089_v42 = vsel %vm1088_vm2, %v1087_v29, %v1084_v37  ;;  %303 = vst [vmem:[#allocation1 + $0x160] sm:$0xff] %v2401_v32  ;;  %s2952_s9 = smov 48  ;;  %s2983_s27 = smov 3 }
  0x20   :  { %v2582_v41 = vpack.i.bf16 %v1203_v15, %v1180_v35  ;;  %v2572_v45 = vpack.i.bf16 %v1111_v30, %v1089_v42  ;;  %333 = vst [vmem:[#allocation1 + $0x150] sm:$0xff] %v2405_v38  ;;  %s2993_s30 = smov 192 }
  0x21   :  { %363 = vst [vmem:[#allocation1 + $0x140] sm:$0xff] %v2409_v43  ;;  %3502 = sst [smem:[#allocation3_spill]] %s2993_s30  ;;  %s3087_s30 = smov 48 }
  0x22   :  { %2583 = vrot.lane.b32.xlu1 %v2582_v41, %s3497_s8  ;;  %2573 = vrot.lane.b32.xlu0 %v2572_v45, %s3497_s8  ;;  %393 = vst [vmem:[#allocation1 + $0x130] sm:$0xff] %v2413_v46 }
  0x23   :  { %423 = vst [vmem:[#allocation1 + $0x120] sm:$0xff] %v2417_v49  ;;  %v1234_v55 = vld [vmem:[#allocation1 + $0x187] ss:$16 sm:%s2925_s28]   ;;  %v1142_v59 = vld [vmem:[#allocation1 + $0x183] ss:$16 sm:%s1141_s11]   ;;  %s2988_s28 = smov 12 }
  0x24   :  { %453 = vst [vmem:[#allocation1 + $0x110] sm:$0xff] %v2421_v50  ;;  %v1237_v56 = vld [vmem:[#allocation1 + $0x187] ss:$16 sm:%s2927_s29]   ;;  %v1145_v60 = vld [vmem:[#allocation1 + $0x183] ss:$16 sm:%s1144_s12]   ;;  %s2990_s29 = smov 48 }
  0x25   :  { %483 = vst [vmem:[#allocation1 + $0x100] sm:$0xff] %v2425_v54  ;;  %v1239_v61 = vsel %vm1078_vm0, %v1237_v56, %v1234_v55  ;;  %v1242_v63 = vld [vmem:[#allocation1 + $0x187] ss:$16 sm:%s2936_s3]   ;;  %3501 = sst [smem:[#allocation2_spill]] %s2990_s29  ;;  %v1147_v3 = vsel %vm1078_vm0, %v1145_v60, %v1142_v59  ;;  %v1150_v4 = vld [vmem:[#allocation1 + $0x183] ss:$16 sm:%s1149_s13]  }
  0x26   :  { %18 = vst [vmem:[#allocation1 + $0x1f8] sm:$0xff] %v2366_v31  ;;  %s2997_s3 = smov 12  ;;  %v1244_v5 = vsel %vm1083_vm1, %v1242_v63, %v1239_v61  ;;  %v1247_v11 = vld [vmem:[#allocation1 + $0x187] ss:$16 sm:%s2938_s4]   ;;  %s3004_s4 = smov 192  ;;  %v1152_v13 = vsel %vm1083_vm1, %v1150_v4, %v1147_v3 }
  0x27   :  { %48 = vst [vmem:[#allocation1 + $0x1e8] sm:$0xff] %v2370_v33  ;;  %v1155_v15 = vld [vmem:[#allocation1 + $0x183] ss:$16 sm:%s2959_s14]   ;;  %s3011_s11 = smov 12  ;;  %s3013_s12 = smov 48  ;;  %v1249_v27 = vsel %vm1088_vm2, %v1247_v11, %v1244_v5 }
  0x28   :  { %78 = vst [vmem:[#allocation1 + $0x1d8] sm:$0xff] %v2374_v34  ;;  %3504 = sst [smem:[#allocation5_spill]] %s3011_s11  ;;  %v1157_v41 = vsel %vm1088_vm2, %v1155_v15, %v1152_v13  ;;  %s3057_s13 = smov 192  ;;  %v1563_v15 = vld [vmem:[#allocation1 + $0x86] ss:$16 sm:%s3064_s1]  }
  0x29   :  { %108 = vst [vmem:[#allocation1 + $0x1c8] sm:$0xff] %v2378_v36  ;;  %3505 = sst [smem:[#allocation6_spill]] %s3013_s12  ;;  %s3059_s14 = smov 3 }
  0x2a   :  { %138 = vst [vmem:[#allocation1 + $0x1b8] sm:$0xff] %v2382_v40  ;;  %s3069_s12 = smov 3  ;;  %s3072_s11 = smov 12  ;;  %v1555_v60 = vld [vmem:[#allocation1 + $0x86] ss:$16 sm:%s3059_s14]  }
  0x2b   :  { %168 = vst [vmem:[#allocation1 + $0x1a8] sm:$0xff] %v2386_v48  ;;  %s3089_s29 = smov 192  ;;  %s3131_s1 = smov 3 }
  0x2c   :  { %v1211_v17 = vld [vmem:[#allocation1 + $0x107] ss:$16 sm:%s2881_s19]   ;;  %v1119_v29 = vld [vmem:[#allocation1 + $0x103] ss:$16 sm:%s2946_s0]   ;;  %s3031_s19 = smov 192  ;;  %198 = vst [vmem:[#allocation1 + $0x198] sm:$0xff] %v2390_v51 }
  0x2d   :  { %v1214_v19 = vld [vmem:[#allocation1 + $0x107] ss:$16 sm:%s2890_s22]   ;;  %v1122_v30 = vld [vmem:[#allocation1 + $0x103] ss:$16 sm:%s2948_s7]   ;;  %3506 = sst [smem:[#allocation7_spill]] %s3031_s19  ;;  %s3036_s22 = smov 3 }
  0x2e   :  { %v1219_v21 = vld [vmem:[#allocation1 + $0x107] ss:$16 sm:%s2892_s23]   ;;  %v1216_v23 = vsel %vm1078_vm0, %v1214_v19, %v1211_v17  ;;  %v1124_v35 = vsel %vm1078_vm0, %v1122_v30, %v1119_v29  ;;  %v1127_v37 = vld [vmem:[#allocation1 + $0x103] ss:$16 sm:%s2952_s9]   ;;  %s3038_s23 = smov 12  ;;  %228 = vst [vmem:[#allocation1 + $0x188] sm:$0xff] %v2394_v52 }
  0x2f   :  { %v1224_v25 = vld [vmem:[#allocation1 + $0x107] ss:$16 sm:%s2915_s25]   ;;  %v1221_v32 = vsel %vm1083_vm1, %v1219_v21, %v1216_v23  ;;  %v1132_v38 = vld [vmem:[#allocation1 + $0x103] ss:$16 sm:%s2954_s10]   ;;  %v1129_v43 = vsel %vm1083_vm1, %v1127_v37, %v1124_v35  ;;  %s3042_s25 = smov 48  ;;  %s3044_s0 = smov 192 }
  0x30   :  { %v1226_v42 = vsel %vm1088_vm2, %v1224_v25, %v1221_v32  ;;  %v1134_v46 = vsel %vm1088_vm2, %v1132_v38, %v1129_v43  ;;  %258 = vst [vmem:[#allocation1 + $0x178] sm:$0xff] %v2398_v53  ;;  %s3047_s7 = smov 3  ;;  %s3051_s9 = smov 12  ;;  %v1545_v52 = vld [vmem:[#allocation1 + $0x6] ss:$16 sm:%s3057_s13]  }
  0x31   :  { %v2587_v45 = vpack.i.bf16 %v1249_v27, %v1226_v42  ;;  %v2577_v49 = vpack.i.bf16 %v1157_v41, %v1134_v46  ;;  %288 = vst [vmem:[#allocation1 + $0x168] sm:$0xff] %v2402_v57  ;;  %s3053_s10 = smov 48  ;;  %s3067_s19 = smov 192  ;;  %v1532_v33 = vld [vmem:[#allocation1 + $0x6] ss:$16 sm:%s3047_s7]  }
  0x32   :  { %318 = vst [vmem:[#allocation1 + $0x158] sm:$0xff] %v2406_v58  ;;  %3508 = sst [smem:[#allocation9_spill]] %s3089_s29  ;;  %s3096_s29 = smov 12  ;;  %v1535_v34 = vld [vmem:[#allocation1 + $0x6] ss:$16 sm:%s3051_s9]  }
  0x33   :  { %2588 = vrot.lane.b32.xlu1 %v2587_v45, %s3497_s8  ;;  %2578 = vrot.lane.b32.xlu0 %v2577_v49, %s3497_s8  ;;  %348 = vst [vmem:[#allocation1 + $0x148] sm:$0xff] %v2410_v62  ;;  %s3062_s8 = smov 12  ;;  %s3106_s7 = smov 3  ;;  %v1540_v61 = vld [vmem:[#allocation1 + $0x6] ss:$16 sm:%s3053_s10]   ;;  %v1537_v48 = vsel %vm1078_vm0, %v1535_v34, %v1532_v33 }
  0x34   :  { %378 = vst [vmem:[#allocation1 + $0x138] sm:$0xff] %v2414_v9  ;;  %v1558_v36 = vld [vmem:[#allocation1 + $0x86] ss:$16 sm:%s3062_s8]   ;;  %s3112_s8 = smov 12  ;;  %s3116_s9 = smov 48  ;;  %v1542_v21 = vsel %vm1083_vm1, %v1540_v61, %v1537_v48 }
  0x35   :  { %408 = vst [vmem:[#allocation1 + $0x128] sm:$0xff] %v2418_v39  ;;  %v1418_v50 = vld [vmem:[#allocation1 + $0x18f] ss:$16 sm:%s2973_s21]   ;;  %s3079_s21 = smov 192  ;;  %s3118_s10 = smov 192  ;;  %v1560_v13 = vsel %vm1078_vm0, %v1558_v36, %v1555_v60  ;;  %v1547_v27 = vsel %vm1088_vm2, %v1545_v52, %v1542_v21 }
  0x36   :  { %438 = vst [vmem:[#allocation1 + $0x118] sm:$0xff] %v2422_v44  ;;  %v1421_v54 = vld [vmem:[#allocation1 + $0x18f] ss:$16 sm:%s2976_s15]   ;;  %3507 = sst [smem:[#allocation8_spill]] %s3079_s21  ;;  %s3082_s15 = smov 3  ;;  %v1565_v23 = vsel %vm1083_vm1, %v1563_v15, %v1560_v13 }
  0x37   :  { %468 = vst [vmem:[#allocation1 + $0x108] sm:$0xff] %v2426_v47  ;;  %s3084_s21 = smov 12  ;;  %v1423_v31 = vsel %vm1078_vm0, %v1421_v54, %v1418_v50  ;;  %v1426_v55 = vld [vmem:[#allocation1 + $0x18f] ss:$16 sm:%s2978_s24]   ;;  %s3094_s24 = smov 3 }
  0x38   :  { %498 = vst [vmem:[#allocation1 + $0xf8] sm:$0xff] %v2430_v0  ;;  %v1431_v56 = vld [vmem:[#allocation1 + $0x18f] ss:$16 sm:%s2981_s26]   ;;  %s3099_s26 = smov 48  ;;  %v1428_v59 = vsel %vm1083_vm1, %v1426_v55, %v1423_v31  ;;  %3510 = sst [smem:[#allocation11_spill]] %s3118_s10 }
  0x39   :  { %528 = vst [vmem:[#allocation1 + $0xe8] sm:$0xff] %v2434_v1  ;;  %3509 = sst [smem:[#allocation10_spill]] %s3099_s26  ;;  %s3101_s26 = smov 192  ;;  %v1433_v11 = vsel %vm1088_vm2, %v1431_v56, %v1428_v59  ;;  %v1568_v25 = vld [vmem:[#allocation1 + $0x86] ss:$16 sm:%s3067_s19]  }
  0x3a   :  { %558 = vst [vmem:[#allocation1 + $0xd8] sm:$0xff] %v2438_v2  ;;  %s3150_s19 = smov 12  ;;  %s3153_s13 = smov 48  ;;  %v1570_v29 = vsel %vm1088_vm2, %v1568_v25, %v1565_v23  ;;  %v1486_v46 = vld [vmem:[#allocation1 + $0x102] ss:$16 sm:%s3069_s12]  }
  0x3b   :  { %588 = vst [vmem:[#allocation1 + $0xc8] sm:$0xff] %v2442_v6  ;;  %s3155_s14 = smov 192  ;;  %s3511_s10 = smov 96   ;;  %v2622_v41 = vpack.i.bf16 %v1570_v29, %v1547_v27  ;;  %v1489_v62 = vld [vmem:[#allocation1 + $0x102] ss:$16 sm:%s3072_s11]  }
  0x3c   :  { %618 = vst [vmem:[#allocation1 + $0xb8] sm:$0xff] %v2446_v7  ;;  %v1509_v49 = vld [vmem:[#allocation1 + $0x182] ss:$16 sm:%s3082_s15]   ;;  %v1696_v1 = vld [vmem:[#allocation1 + $0x18a] ss:$16 sm:%s3150_s19]   ;;  %s3205_s11 = smov 12 }
  0x3d   :  { %648 = vst [vmem:[#allocation1 + $0xa8] sm:$0xff] %v2450_v8  ;;  %v1512_v9 = vld [vmem:[#allocation1 + $0x182] ss:$16 sm:%s3084_s21]   ;;  %v1701_v50 = vld [vmem:[#allocation1 + $0x18a] ss:$16 sm:%s3153_s13]   ;;  %s3515_s12 = sld [smem:[#allocation10_spill]] }
  0x3e   :  { %v1395_v63 = vld [vmem:[#allocation1 + $0x10f] ss:$16 sm:%s2961_s16]   ;;  %678 = vst [vmem:[#allocation1 + $0x98] sm:$0xff] %v2454_v10  ;;  %s3135_s16 = smov 12  ;;  %v1670_v30 = vld [vmem:[#allocation1 + $0x10a] ss:$16 sm:%s3131_s1]  }
  0x3f   :  { %v1398_v40 = vld [vmem:[#allocation1 + $0x10f] ss:$16 sm:%s2963_s17]   ;;  %708 = vst [vmem:[#allocation1 + $0x88] sm:$0xff] %v2458_v12  ;;  %s3137_s17 = smov 48  ;;  %s3166_s1 = smov 48 }
  0x40   :  { %v1403_v3 = vld [vmem:[#allocation1 + $0x10f] ss:$16 sm:%s2966_s18]   ;;  %v1400_v4 = vsel %vm1078_vm0, %v1398_v40, %v1395_v63  ;;  %738 = vst [vmem:[#allocation1 + $0x78] sm:$0xff] %v2462_v14  ;;  %s3141_s18 = smov 192  ;;  %3513 = sst [smem:[#allocation13_spill]] %s3166_s1  ;;  %v1491_v40 = vsel %vm1078_vm0, %v1489_v62, %v1486_v46 }
  0x41   :  { %v1408_v5 = vld [vmem:[#allocation1 + $0x10f] ss:$16 sm:%s2968_s20]   ;;  %v1405_v51 = vsel %vm1083_vm1, %v1403_v3, %v1400_v4  ;;  %s3143_s20 = smov 3  ;;  %768 = vst [vmem:[#allocation1 + $0x68] sm:$0xff] %v2466_v16  ;;  %s3168_s1 = smov 192  ;;  %v1514_v3 = vsel %vm1078_vm0, %v1512_v9, %v1509_v49 }
  0x42   :  { %v1410_v17 = vsel %vm1088_vm2, %v1408_v5, %v1405_v51  ;;  %798 = vst [vmem:[#allocation1 + $0x58] sm:$0xff] %v2470_v18  ;;  %v1673_v53 = vld [vmem:[#allocation1 + $0x10a] ss:$16 sm:%s3135_s16]   ;;  %s3172_s16 = smov 3  ;;  %v1303_v2 = vld [vmem:[#allocation1 + $0x10b] ss:$16 sm:%s3094_s24]  }
  0x43   :  { %v2607_v19 = vpack.i.bf16 %v1433_v11, %v1410_v17  ;;  %828 = vst [vmem:[#allocation1 + $0x48] sm:$0xff] %v2474_v20  ;;  %v1678_v32 = vld [vmem:[#allocation1 + $0x10a] ss:$16 sm:%s3137_s17]   ;;  %v1675_v38 = vsel %vm1078_vm0, %v1673_v53, %v1670_v30  ;;  %s3181_s17 = smov 192  ;;  %v1306_v6 = vld [vmem:[#allocation1 + $0x10b] ss:$16 sm:%s3096_s29]  }
  0x44   :  { %858 = vst [vmem:[#allocation1 + $0x38] sm:$0xff] %v2478_v22  ;;  %v1680_v39 = vsel %vm1083_vm1, %v1678_v32, %v1675_v38  ;;  %v1683_v44 = vld [vmem:[#allocation1 + $0x10a] ss:$16 sm:%s3141_s18]   ;;  %s3203_s29 = smov 3  ;;  %v1326_v8 = vld [vmem:[#allocation1 + $0x18b] ss:$16 sm:%s3106_s7]   ;;  %v1308_v15 = vsel %vm1078_vm0, %v1306_v6, %v1303_v2 }
  0x45   :  { %2608 = vrot.lane.b32.xlu1 %v2607_v19, %s3511_s10  ;;  %s3159_s10 = smov 3  ;;  %888 = vst [vmem:[#allocation1 + $0x28] sm:$0xff] %v2482_v24  ;;  %v1693_v47 = vld [vmem:[#allocation1 + $0x18a] ss:$16 sm:%s3143_s20]   ;;  %v1685_v56 = vsel %vm1088_vm2, %v1683_v44, %v1680_v39  ;;  %v1494_v59 = vld [vmem:[#allocation1 + $0x102] ss:$16 sm:%s3074_s6]  }
  0x46   :  { %3512 = sst [smem:[#allocation12_spill]] %s3159_s10  ;;  %s3161_s10 = smov 12  ;;  %918 = vst [vmem:[#allocation1 + $0x18] sm:$0xff] %v2486_v26  ;;  %v1372_v35 = vld [vmem:[#allocation1 + $0x8f] ss:$16 sm:%s2995_s2]   ;;  %v1698_v7 = vsel %vm1078_vm0, %v1696_v1, %v1693_v47  ;;  %v1496_v53 = vsel %vm1083_vm1, %v1494_v59, %v1491_v40 }
  0x47   :  { %v1375_v37 = vld [vmem:[#allocation1 + $0x8f] ss:$16 sm:%s2997_s3]   ;;  %s3177_s2 = smov 12  ;;  %948 = vst [vmem:[#allocation1 + $0x8] sm:$0xff] %v2490_v28  ;;  %s3179_s3 = smov 48  ;;  %v1703_v10 = vsel %vm1083_vm1, %v1701_v50, %v1698_v7 }
  0x48   :  { %v1380_v57 = vld [vmem:[#allocation1 + $0x8f] ss:$16 sm:%s2999_s5]   ;;  %v1280_v42 = vld [vmem:[#allocation1 + $0x8b] ss:$16 sm:%s3036_s22]   ;;  %v1377_v58 = vsel %vm1078_vm0, %v1375_v37, %v1372_v35  ;;  %v1706_v54 = vld [vmem:[#allocation1 + $0x18a] ss:$16 sm:%s3155_s14]  }
  0x49   :  { %v1283_v43 = vld [vmem:[#allocation1 + $0x8b] ss:$16 sm:%s3038_s23]   ;;  %s2693_s5 = smov 64   ;;  %v1382_v31 = vsel %vm1083_vm1, %v1380_v57, %v1377_v58  ;;  %v1385_v55 = vld [vmem:[#allocation1 + $0x8f] ss:$16 sm:%s3004_s4]   ;;  %s3514_s4 = sld [smem:[#allocation2_spill]]  ;;  %v1708_v36 = vsel %vm1088_vm2, %v1706_v54, %v1703_v10 }
  0x4a   :  { %v1288_v45 = vld [vmem:[#allocation1 + $0x8b] ss:$16 sm:%s3042_s25]   ;;  %v1285_v0 = vsel %vm1078_vm0, %v1283_v43, %v1280_v42  ;;  %s3212_s22 = smov 48  ;;  %s3214_s23 = smov 192  ;;  %v1517_v12 = vld [vmem:[#allocation1 + $0x182] ss:$16 sm:%s3087_s30]   ;;  %v1387_v11 = vsel %vm1088_vm2, %v1385_v55, %v1382_v31  ;;  %v2637_v51 = vpack.i.bf16 %v1708_v36, %v1685_v56 }
  0x4b   :  { %v1290_v33 = vsel %vm1083_vm1, %v1288_v45, %v1285_v0  ;;  %s3516_s25 = sld [smem:[#allocation3_spill]]  ;;  %v1293_v34 = vld [vmem:[#allocation1 + $0x8b] ss:$16 sm:%s3044_s0]   ;;  %s3222_s0 = smov 3  ;;  %v1519_v32 = vsel %vm1083_vm1, %v1517_v12, %v1514_v3  ;;  %v1647_v38 = vld [vmem:[#allocation1 + $0x8a] ss:$16 sm:%s3172_s16]  }
  0x4c   :  { %s3517_s6 = sld [smem:[#allocation4_spill]]  ;;  %v1329_v60 = vld [vmem:[#allocation1 + $0x18b] ss:$16 sm:%s3112_s8]   ;;  %s3224_s21 = smov 12  ;;  %v1295_v24 = vsel %vm1088_vm2, %v1293_v34, %v1290_v33  ;;  %v1441_v58 = vld [vmem:[#allocation1 + $0x2] ss:$16 sm:%s3203_s29]  }
  0x4d   :  { %2623 = vrot.lane.b32.xlu1 %v2622_v41, %s2693_s5  ;;  %s3518_s30 = sld [smem:[#allocation5_spill]]  ;;  %v1311_v16 = vld [vmem:[#allocation1 + $0x10b] ss:$16 sm:%s3515_s12]   ;;  %v1331_v23 = vsel %vm1078_vm0, %v1329_v60, %v1326_v8  ;;  %s1810_s18 = smov 12  ;;  %v1650_v41 = vld [vmem:[#allocation1 + $0x8a] ss:$16 sm:%s3177_s2]  }
  0x4e   :  { %v1349_v14 = vld [vmem:[#allocation1 + $0xf] ss:$16 sm:%s2983_s27]   ;;  %s3519_s27 = sld [smem:[#allocation6_spill]]  ;;  %v1334_v18 = vld [vmem:[#allocation1 + $0x18b] ss:$16 sm:%s3116_s9]   ;;  %s1807_s9 = smov 3  ;;  %v1313_v42 = vsel %vm1083_vm1, %v1311_v16, %v1308_v15  ;;  %v1652_v10 = vsel %vm1078_vm0, %v1650_v41, %v1647_v38 }
  0x4f   :  { %v1352_v61 = vld [vmem:[#allocation1 + $0xf] ss:$16 sm:%s2988_s28]   ;;  %s3520_s28 = sld [smem:[#allocation7_spill]]  ;;  %v1316_v28 = vld [vmem:[#allocation1 + $0x10b] ss:$16 sm:%s3101_s26]   ;;  %s3251_s26 = smov 48  ;;  %v1336_v43 = vsel %vm1083_vm1, %v1334_v18, %v1331_v23 }
  0x50   :  { %v1357_v63 = vld [vmem:[#allocation1 + $0xf] ss:$16 sm:%s3514_s4]   ;;  %s3521_s15 = sld [smem:[#allocation8_spill]]  ;;  %v1354_v4 = vsel %vm1078_vm0, %v1352_v61, %v1349_v14  ;;  %s3253_s20 = smov 192  ;;  %v1627_v37 = vld [vmem:[#allocation1 + $0xa] ss:$16 sm:%s3161_s10]   ;;  %v1318_v6 = vsel %vm1088_vm2, %v1316_v28, %v1313_v42 }
  0x51   :  { %s3522_s24 = sld [smem:[#allocation9_spill]]  ;;  %v1362_v5 = vld [vmem:[#allocation1 + $0xf] ss:$16 sm:%s3516_s25]   ;;  %v1359_v20 = vsel %vm1083_vm1, %v1357_v63, %v1354_v4  ;;  %v1444_v45 = vld [vmem:[#allocation1 + $0x2] ss:$16 sm:%s3205_s11]   ;;  %s1815_s10 = smov 48 }
  0x52   :  { %v1257_v48 = vld [vmem:[#allocation1 + $0xb] ss:$16 sm:%s3517_s6]   ;;  %s3523_s7 = sld [smem:[#allocation11_spill]]  ;;  %v1364_v25 = vsel %vm1088_vm2, %v1362_v5, %v1359_v20  ;;  %v1463_v46 = vld [vmem:[#allocation1 + $0x82] ss:$16 sm:%s3222_s0]   ;;  %s1820_s19 = smov 192  ;;  %v1446_v36 = vsel %vm1078_vm0, %v1444_v45, %v1441_v58 }
  0x53   :  { %v1260_v13 = vld [vmem:[#allocation1 + $0xb] ss:$16 sm:%s3518_s30]   ;;  %s3524_s8 = sld [smem:[#allocation12_spill]]  ;;  %v2602_v29 = vpack.i.bf16 %v1387_v11, %v1364_v25  ;;  %v1808_v62 = vld [vmem:[#allocation1 + $0x1] ss:$16 sm:%s1807_s9]   ;;  %s3525_s13 = smov 96  }
  0x54   :  { %v1262_v17 = vsel %vm1078_vm0, %v1260_v13, %v1257_v48  ;;  %v1265_v22 = vld [vmem:[#allocation1 + $0xb] ss:$16 sm:%s3519_s27]   ;;  %v1811_v49 = vld [vmem:[#allocation1 + $0x1] ss:$16 sm:%s1810_s18]   ;;  %s1829_s14 = smov 3  ;;  %s3526_s16 = sld [smem:[#allocation13_spill]] }
  0x55   :  { %v1270_v19 = vld [vmem:[#allocation1 + $0xb] ss:$16 sm:%s3520_s28]   ;;  %v1267_v26 = vsel %vm1083_vm1, %v1265_v22, %v1262_v17  ;;  %2638 = vrot.lane.b32.xlu1 %v2637_v51, %s2693_s5  ;;  %2603 = vrot.lane.b32.xlu0 %v2602_v29, %s3525_s13  ;;  %v1813_v9 = vsel %vm1078_vm0, %v1811_v49, %v1808_v62  ;;  %v1816_v39 = vld [vmem:[#allocation1 + $0x1] ss:$16 sm:%s1815_s10]   ;;  %s1832_s2 = smov 12  ;;  %s1842_s29 = smov 192 }
  0x56   :  { %v1499_v21 = vld [vmem:[#allocation1 + $0x102] ss:$16 sm:%s3521_s15]   ;;  %v1272_v30 = vsel %vm1088_vm2, %v1270_v19, %v1267_v26  ;;  %v1821_v44 = vld [vmem:[#allocation1 + $0x1] ss:$16 sm:%s1820_s19]   ;;  %v1655_v1 = vld [vmem:[#allocation1 + $0x8a] ss:$16 sm:%s3179_s3]   ;;  %v1818_v54 = vsel %vm1083_vm1, %v1816_v39, %v1813_v9 }
  0x57   :  { %v1522_v52 = vld [vmem:[#allocation1 + $0x182] ss:$16 sm:%s3522_s24]   ;;  %v2592_v57 = vpack.i.bf16 %v1295_v24, %v1272_v30  ;;  %v1501_v47 = vsel %vm1088_vm2, %v1499_v21, %v1496_v53  ;;  %v1830_v2 = vld [vmem:[#allocation1 + $0x81] ss:$16 sm:%s1829_s14]   ;;  %s1837_s3 = smov 48  ;;  %s1761_s11 = smov 3  ;;  %v1823_v33 = vsel %vm1088_vm2, %v1821_v44, %v1818_v54  ;;  %v1657_v11 = vsel %vm1083_vm1, %v1655_v1, %v1652_v10 }
  0x58   :  { %v1339_v27 = vld [vmem:[#allocation1 + $0x18b] ss:$16 sm:%s3523_s7]   ;;  %v1524_v0 = vsel %vm1088_vm2, %v1522_v52, %v1519_v32  ;;  %v1466_v50 = vld [vmem:[#allocation1 + $0x82] ss:$16 sm:%s3224_s21]   ;;  %v1833_v31 = vld [vmem:[#allocation1 + $0x81] ss:$16 sm:%s1832_s2]  }
  0x59   :  { %v1624_v35 = vld [vmem:[#allocation1 + $0xa] ss:$16 sm:%s3524_s8]   ;;  %2593 = vrot.lane.b32.xlu2 %v2592_v57, %s3525_s13  ;;  %v1341_v7 = vsel %vm1088_vm2, %v1339_v27, %v1336_v43  ;;  %v1838_v55 = vld [vmem:[#allocation1 + $0x81] ss:$16 sm:%s1837_s3]   ;;  %v1835_v34 = vsel %vm1078_vm0, %v1833_v31, %v1830_v2  ;;  %s1764_s4 = smov 12  ;;  %s3283_s12 = smov 48  ;;  %v2617_v12 = vpack.i.bf16 %v1524_v0, %v1501_v47  ;;  %v1468_v61 = vsel %vm1078_vm0, %v1466_v50, %v1463_v46 }
  0x5a   :  { %v1629_v8 = vsel %vm1078_vm0, %v1627_v37, %v1624_v35  ;;  %v1632_v56 = vld [vmem:[#allocation1 + $0xa] ss:$16 sm:%s3526_s16]   ;;  %v1843_v59 = vld [vmem:[#allocation1 + $0x81] ss:$16 sm:%s1842_s29]   ;;  %v1449_v14 = vld [vmem:[#allocation1 + $0x2] ss:$16 sm:%s3212_s22]   ;;  %v1840_v40 = vsel %vm1083_vm1, %v1838_v55, %v1835_v34  ;;  %v2597_v3 = vpack.i.bf16 %v1341_v7, %v1318_v6 }
  0x5b   :  { %v1660_v60 = vld [vmem:[#allocation1 + $0x8a] ss:$16 sm:%s3181_s17]   ;;  %v1471_v63 = vld [vmem:[#allocation1 + $0x82] ss:$16 sm:%s3251_s26]   ;;  %s3291_s17 = smov 192  ;;  %s1784_s22 = smov 3  ;;  %v1845_v4 = vsel %vm1088_vm2, %v1843_v59, %v1840_v40  ;;  %v1634_v5 = vsel %vm1083_vm1, %v1632_v56, %v1629_v8  ;;  %v1451_v51 = vsel %vm1083_vm1, %v1449_v14, %v1446_v36 }
  0x5c   :  { %v1637_v16 = vld [vmem:[#allocation1 + $0xa] ss:$16 sm:%s3168_s1]   ;;  %v1454_v18 = vld [vmem:[#allocation1 + $0x2] ss:$16 sm:%s3214_s23]   ;;  %s1787_s1 = smov 12  ;;  %s1792_s23 = smov 48  ;;  %v2652_v13 = vpack.i.bf16 %v1845_v4, %v1823_v33  ;;  %v1473_v20 = vsel %vm1083_vm1, %v1471_v63, %v1468_v61  ;;  %v1662_v52 = vsel %vm1088_vm2, %v1660_v60, %v1657_v11 }
  0x5d   :  { %v1476_v48 = vld [vmem:[#allocation1 + $0x82] ss:$16 sm:%s3253_s20]   ;;  %v1762_v15 = vld [vmem:[#allocation1 + $0x10e] ss:$16 sm:%s1761_s11]   ;;  %s3299_s25 = smov 192  ;;  %s1577_s6 = smov 3  ;;  %2618 = vrot.lane.b32.xlu0 %v2617_v12, %s2693_s5  ;;  %v1639_v21 = vsel %vm1088_vm2, %v1637_v16, %v1634_v5  ;;  %v1456_v27 = vsel %vm1088_vm2, %v1454_v18, %v1451_v51 }
  0x5e   :  { %v1765_v17 = vld [vmem:[#allocation1 + $0x10e] ss:$16 sm:%s1764_s4]   ;;  %s1580_s30 = smov 12  ;;  %s1585_s0 = smov 48  ;;  %v1578_v24 = vld [vmem:[#allocation1 + $0x106] ss:$16 sm:%s1577_s6]   ;;  %v1478_v29 = vsel %vm1088_vm2, %v1476_v48, %v1473_v20  ;;  %v2632_v41 = vpack.i.bf16 %v1662_v52, %v1639_v21 }
  0x5f   :  { %v1785_v22 = vld [vmem:[#allocation1 + $0x18e] ss:$16 sm:%s1784_s22]   ;;  %s2694_s21 = smov 32   ;;  %s3305_s27 = smov 192  ;;  %v1581_v26 = vld [vmem:[#allocation1 + $0x106] ss:$16 sm:%s1580_s30]   ;;  %v1767_v32 = vsel %vm1078_vm0, %v1765_v17, %v1762_v15  ;;  %v2612_v62 = vpack.i.bf16 %v1478_v29, %v1456_v27 }
  0x60   :  { %2653 = vrot.lane.b32.xlu1 %v2652_v13, %s2694_s21  ;;  %v1788_v19 = vld [vmem:[#allocation1 + $0x18e] ss:$16 sm:%s1787_s1]   ;;  %s1600_s28 = smov 3  ;;  %s1603_s15 = smov 12  ;;  %v1586_v30 = vld [vmem:[#allocation1 + $0x106] ss:$16 sm:%s1585_s0]   ;;  %v1583_v43 = vsel %vm1078_vm0, %v1581_v26, %v1578_v24 }
  0x61   :  { %2598 = vrot.lane.b32.xlu2 %v2597_v3, %s3525_s13  ;;  %v1770_v23 = vld [vmem:[#allocation1 + $0x10e] ss:$16 sm:%s3283_s12]   ;;  %v1601_v28 = vld [vmem:[#allocation1 + $0x186] ss:$16 sm:%s1600_s28]   ;;  %s1608_s24 = smov 48  ;;  %s3313_s7 = smov 192  ;;  %v1790_v35 = vsel %vm1078_vm0, %v1788_v19, %v1785_v22  ;;  %v1588_v2 = vsel %vm1083_vm1, %v1586_v30, %v1583_v43 }
  0x62   :  { %v1793_v25 = vld [vmem:[#allocation1 + $0x18e] ss:$16 sm:%s1792_s23]   ;;  %v1604_v53 = vld [vmem:[#allocation1 + $0x186] ss:$16 sm:%s1603_s15]   ;;  %s1944_s8 = smov 3  ;;  %s1947_s9 = smov 12  ;;  %v1772_v47 = vsel %vm1083_vm1, %v1770_v23, %v1767_v32 }
  0x63   :  { %v1609_v37 = vld [vmem:[#allocation1 + $0x186] ss:$16 sm:%s1608_s24]   ;;  %v1945_v38 = vld [vmem:[#allocation1 + $0x105] ss:$16 sm:%s1944_s8]   ;;  %s1952_s18 = smov 48  ;;  %v1606_v58 = vsel %vm1078_vm0, %v1604_v53, %v1601_v28  ;;  %s1957_s26 = smov 192  ;;  %v1795_v0 = vsel %vm1083_vm1, %v1793_v25, %v1790_v35 }
  0x64   :  { %v1775_v57 = vld [vmem:[#allocation1 + $0x10e] ss:$16 sm:%s3291_s17]   ;;  %v1948_v45 = vld [vmem:[#allocation1 + $0x105] ss:$16 sm:%s1947_s9]   ;;  %s1967_s20 = smov 3  ;;  %s1970_s10 = smov 12  ;;  %v1611_v6 = vsel %vm1083_vm1, %v1609_v37, %v1606_v58 }
  0x65   :  { %v1798_v42 = vld [vmem:[#allocation1 + $0x18e] ss:$16 sm:%s3299_s25]   ;;  %v1953_v46 = vld [vmem:[#allocation1 + $0x105] ss:$16 sm:%s1952_s18]   ;;  %v1591_v49 = vld [vmem:[#allocation1 + $0x106] ss:$16 sm:%s3305_s27]   ;;  %v1950_v9 = vsel %vm1078_vm0, %v1948_v45, %v1945_v38  ;;  %2633 = vrot.lane.b32.xlu0 %v2632_v41, %s2693_s5  ;;  %v1777_v34 = vsel %vm1088_vm2, %v1775_v57, %v1772_v47 }
  0x66   :  { %v1958_v39 = vld [vmem:[#allocation1 + $0x105] ss:$16 sm:%s1957_s26]   ;;  %s1975_s19 = smov 48  ;;  %v1955_v1 = vsel %vm1083_vm1, %v1953_v46, %v1950_v9  ;;  %s1980_s13 = smov 192  ;;  %v1614_v7 = vld [vmem:[#allocation1 + $0x186] ss:$16 sm:%s3313_s7]   ;;  %v1800_v59 = vsel %vm1088_vm2, %v1798_v42, %v1795_v0  ;;  %v1593_v36 = vsel %vm1088_vm2, %v1591_v49, %v1588_v2 }
  0x67   :  { %v1968_v44 = vld [vmem:[#allocation1 + $0x185] ss:$16 sm:%s1967_s20]   ;;  %s1898_s14 = smov 3  ;;  %v1960_v31 = vsel %vm1088_vm2, %v1958_v39, %v1955_v1  ;;  %s1901_s16 = smov 12  ;;  %v1616_v14 = vsel %vm1088_vm2, %v1614_v7, %v1611_v6  ;;  %v2647_v5 = vpack.i.bf16 %v1800_v59, %v1777_v34 }
  0x68   :  { %v1971_v50 = vld [vmem:[#allocation1 + $0x185] ss:$16 sm:%s1970_s10]   ;;  %s1906_s2 = smov 48  ;;  %s1911_s3 = smov 192  ;;  %v2627_v51 = vpack.i.bf16 %v1616_v14, %v1593_v36 }
  0x69   :  { %v1976_v54 = vld [vmem:[#allocation1 + $0x185] ss:$16 sm:%s1975_s19]   ;;  %v1973_v55 = vsel %vm1078_vm0, %v1971_v50, %v1968_v44  ;;  %s1921_s29 = smov 3  ;;  %2613 = vrot.lane.b32.xlu2 %v2612_v62, %s2693_s5  ;;  %s1924_s11 = smov 12 }
  0x6a   :  { %v1981_v8 = vld [vmem:[#allocation1 + $0x185] ss:$16 sm:%s1980_s13]   ;;  %v1978_v56 = vsel %vm1083_vm1, %v1976_v54, %v1973_v55  ;;  %s1929_s4 = smov 48  ;;  %s1934_s12 = smov 192 }
  0x6b   :  { %v1899_v10 = vld [vmem:[#allocation1 + $0x5] ss:$16 sm:%s1898_s14]   ;;  %v1983_v12 = vsel %vm1088_vm2, %v1981_v8, %v1978_v56  ;;  %s1715_s17 = smov 3  ;;  %s1718_s22 = smov 12 }
  0x6c   :  { %v1902_v33 = vld [vmem:[#allocation1 + $0x5] ss:$16 sm:%s1901_s16]   ;;  %v2667_v61 = vpack.i.bf16 %v1983_v12, %v1960_v31  ;;  %v1716_v4 = vld [vmem:[#allocation1 + $0xe] ss:$16 sm:%s1715_s17]   ;;  %s1723_s1 = smov 48  ;;  %s1728_s23 = smov 192 }
  0x6d   :  { %v1922_v60 = vld [vmem:[#allocation1 + $0x85] ss:$16 sm:%s1921_s29]   ;;  %v1904_v3 = vsel %vm1078_vm0, %v1902_v33, %v1899_v10  ;;  %v1719_v13 = vld [vmem:[#allocation1 + $0xe] ss:$16 sm:%s1718_s22]   ;;  %s1738_s25 = smov 3  ;;  %s1741_s6 = smov 12  ;;  %2648 = vrot.lane.b32.xlu0 %v2647_v5, %s2693_s5 }
  0x6e   :  { %v1907_v63 = vld [vmem:[#allocation1 + $0x5] ss:$16 sm:%s1906_s2]   ;;  %2668 = vrot.lane.b32.xlu1 %v2667_v61, %s2694_s21  ;;  %v1724_v15 = vld [vmem:[#allocation1 + $0xe] ss:$16 sm:%s1723_s1]   ;;  %v1721_v20 = vsel %vm1078_vm0, %v1719_v13, %v1716_v4  ;;  %s1746_s30 = smov 48  ;;  %s1751_s0 = smov 192 }
  0x6f   :  { %v1925_v40 = vld [vmem:[#allocation1 + $0x85] ss:$16 sm:%s1924_s11]   ;;  %v1729_v17 = vld [vmem:[#allocation1 + $0xe] ss:$16 sm:%s1728_s23]   ;;  %v1909_v19 = vsel %vm1083_vm1, %v1907_v63, %v1904_v3  ;;  %s2082_s27 = smov 3  ;;  %v1726_v23 = vsel %vm1083_vm1, %v1724_v15, %v1721_v20  ;;  %s2085_s28 = smov 12 }
  0x70   :  { %v1927_v16 = vsel %vm1078_vm0, %v1925_v40, %v1922_v60  ;;  %v1930_v18 = vld [vmem:[#allocation1 + $0x85] ss:$16 sm:%s1929_s4]   ;;  %v1739_v22 = vld [vmem:[#allocation1 + $0x8e] ss:$16 sm:%s1738_s25]   ;;  %v2083_v28 = vld [vmem:[#allocation1 + $0xd] ss:$16 sm:%s2082_s27]   ;;  %v1731_v41 = vsel %vm1088_vm2, %v1729_v17, %v1726_v23 }
  0x71   :  { %v1912_v11 = vld [vmem:[#allocation1 + $0x5] ss:$16 sm:%s1911_s3]   ;;  %v1932_v24 = vsel %vm1083_vm1, %v1930_v18, %v1927_v16  ;;  %v1742_v21 = vld [vmem:[#allocation1 + $0x8e] ss:$16 sm:%s1741_s6]   ;;  %s2090_s15 = smov 48  ;;  %s2095_s24 = smov 192  ;;  %2628 = vrot.lane.b32.xlu2 %v2627_v51, %s2693_s5 }
  0x72   :  { %v1935_v48 = vld [vmem:[#allocation1 + $0x85] ss:$16 sm:%s1934_s12]   ;;  %v1747_v52 = vld [vmem:[#allocation1 + $0x8e] ss:$16 sm:%s1746_s30]   ;;  %v1744_v25 = vsel %vm1078_vm0, %v1742_v21, %v1739_v22  ;;  %v2086_v29 = vld [vmem:[#allocation1 + $0xd] ss:$16 sm:%s2085_s28]   ;;  %v1914_v53 = vsel %vm1088_vm2, %v1912_v11, %v1909_v19 }
  0x73   :  { %v1752_v26 = vld [vmem:[#allocation1 + $0x8e] ss:$16 sm:%s1751_s0]   ;;  %v1749_v27 = vsel %vm1083_vm1, %v1747_v52, %v1744_v25  ;;  %v2091_v30 = vld [vmem:[#allocation1 + $0xd] ss:$16 sm:%s2090_s15]   ;;  %s2105_s7 = smov 3  ;;  %v1937_v32 = vsel %vm1088_vm2, %v1935_v48, %v1932_v24  ;;  %v2088_v35 = vsel %vm1078_vm0, %v2086_v29, %v2083_v28  ;;  %s2108_s8 = smov 12 }
  0x74   :  { %v2096_v37 = vld [vmem:[#allocation1 + $0xd] ss:$16 sm:%s2095_s24]   ;;  %s2113_s9 = smov 48  ;;  %v1754_v57 = vsel %vm1088_vm2, %v1752_v26, %v1749_v27  ;;  %v2093_v42 = vsel %vm1083_vm1, %v2091_v30, %v2088_v35  ;;  %s2118_s18 = smov 192  ;;  %v2662_v9 = vpack.i.bf16 %v1937_v32, %v1914_v53 }
  0x75   :  { %v2106_v38 = vld [vmem:[#allocation1 + $0x8d] ss:$16 sm:%s2105_s7]   ;;  %s2036_s26 = smov 3  ;;  %v2098_v45 = vsel %vm1088_vm2, %v2096_v37, %v2093_v42  ;;  %s2039_s20 = smov 12  ;;  %v2642_v0 = vpack.i.bf16 %v1754_v57, %v1731_v41 }
  0x76   :  { %v2109_v43 = vld [vmem:[#allocation1 + $0x8d] ss:$16 sm:%s2108_s8]   ;;  %v2037_v49 = vld [vmem:[#allocation1 + $0x109] ss:$16 sm:%s2036_s26]   ;;  %s2044_s10 = smov 48  ;;  %s2049_s19 = smov 192  ;;  %2663 = vrot.lane.b32.xlu0 %v2662_v9, %s2694_s21 }
  0x77   :  { %v2114_v58 = vld [vmem:[#allocation1 + $0x8d] ss:$16 sm:%s2113_s9]   ;;  %v2111_v46 = vsel %vm1078_vm0, %v2109_v43, %v2106_v38  ;;  %v2040_v44 = vld [vmem:[#allocation1 + $0x109] ss:$16 sm:%s2039_s20]   ;;  %s2059_s13 = smov 3  ;;  %s2062_s14 = smov 12 }
  0x78   :  { %v2119_v62 = vld [vmem:[#allocation1 + $0x8d] ss:$16 sm:%s2118_s18]   ;;  %v2116_v39 = vsel %vm1083_vm1, %v2114_v58, %v2111_v46  ;;  %v2045_v47 = vld [vmem:[#allocation1 + $0x109] ss:$16 sm:%s2044_s10]   ;;  %v2042_v50 = vsel %vm1078_vm0, %v2040_v44, %v2037_v49  ;;  %s2067_s16 = smov 48  ;;  %s2072_s2 = smov 192 }
  0x79   :  { %v2121_v1 = vsel %vm1088_vm2, %v2119_v62, %v2116_v39  ;;  %v2050_v54 = vld [vmem:[#allocation1 + $0x109] ss:$16 sm:%s2049_s19]   ;;  %v2047_v7 = vsel %vm1083_vm1, %v2045_v47, %v2042_v50  ;;  %s1852_s3 = smov 3  ;;  %s1855_s29 = smov 12  ;;  %2643 = vrot.lane.b32.xlu2 %v2642_v0, %s2693_s5  ;;  %v962_v44 = vld [vmem:[#allocation1] ss:$4 sm:$0xff]  }
  0x7a   :  { %v2060_v2 = vld [vmem:[#allocation1 + $0x189] ss:$16 sm:%s2059_s13]   ;;  %v2682_v6 = vpack.i.bf16 %v2121_v1, %v2098_v45  ;;  %v1853_v10 = vld [vmem:[#allocation1 + $0x101] ss:$16 sm:%s1852_s3]   ;;  %s1860_s11 = smov 48  ;;  %s1865_s4 = smov 192  ;;  %v2052_v12 = vsel %vm1088_vm2, %v2050_v54, %v2047_v7 }
  0x7b   :  { %v2063_v31 = vld [vmem:[#allocation1 + $0x189] ss:$16 sm:%s2062_s14]   ;;  %v1856_v34 = vld [vmem:[#allocation1 + $0x101] ss:$16 sm:%s1855_s29]   ;;  %s1875_s12 = smov 3  ;;  %s1878_s5 = smov 12 }
  0x7c   :  { %v2068_v55 = vld [vmem:[#allocation1 + $0x189] ss:$16 sm:%s2067_s16]   ;;  %v2065_v8 = vsel %vm1078_vm0, %v2063_v31, %v2060_v2  ;;  %2683 = vrot.lane.b32.xlu1 %v2682_v6, %s2694_s21  ;;  %v1861_v59 = vld [vmem:[#allocation1 + $0x101] ss:$16 sm:%s1860_s11]   ;;  %v1858_v36 = vsel %vm1078_vm0, %v1856_v34, %v1853_v10  ;;  %s1883_s17 = smov 48  ;;  %s1888_s22 = smov 192 }
  0x7d   :  { %v2073_v56 = vld [vmem:[#allocation1 + $0x189] ss:$16 sm:%s2072_s2]   ;;  %v2070_v33 = vsel %vm1083_vm1, %v2068_v55, %v2065_v8  ;;  %v1866_v14 = vld [vmem:[#allocation1 + $0x101] ss:$16 sm:%s1865_s4]   ;;  %v1863_v63 = vsel %vm1083_vm1, %v1861_v59, %v1858_v36  ;;  %s1990_s1 = smov 3  ;;  %s1993_s23 = smov 12 }
  0x7e   :  { %v2075_v60 = vsel %vm1088_vm2, %v2073_v56, %v2070_v33  ;;  %v1876_v61 = vld [vmem:[#allocation1 + $0x181] ss:$16 sm:%s1875_s12]   ;;  %v1868_v16 = vsel %vm1088_vm2, %v1866_v14, %v1863_v63  ;;  %v1991_v5 = vld [vmem:[#allocation1 + $0x9] ss:$16 sm:%s1990_s1]   ;;  %s1998_s25 = smov 48  ;;  %s2003_s6 = smov 192 }
  0x7f   :  { %v1879_v40 = vld [vmem:[#allocation1 + $0x181] ss:$16 sm:%s1878_s5]   ;;  %v2677_v11 = vpack.i.bf16 %v2075_v60, %v2052_v12  ;;  %v1994_v13 = vld [vmem:[#allocation1 + $0x9] ss:$16 sm:%s1993_s23]   ;;  %s2013_s30 = smov 3  ;;  %s2016_s0 = smov 12 }
  0x80   :  { %v1884_v3 = vld [vmem:[#allocation1 + $0x181] ss:$16 sm:%s1883_s17]   ;;  %v1881_v18 = vsel %vm1078_vm0, %v1879_v40, %v1876_v61  ;;  %v1999_v15 = vld [vmem:[#allocation1 + $0x9] ss:$16 sm:%s1998_s25]   ;;  %v1996_v20 = vsel %vm1078_vm0, %v1994_v13, %v1991_v5  ;;  %s2021_s27 = smov 48  ;;  %s2026_s28 = smov 192 }
  0x81   :  { %v1889_v4 = vld [vmem:[#allocation1 + $0x181] ss:$16 sm:%s1888_s22]   ;;  %v1886_v48 = vsel %vm1083_vm1, %v1884_v3, %v1881_v18  ;;  %v2014_v17 = vld [vmem:[#allocation1 + $0x89] ss:$16 sm:%s2013_s30]   ;;  %s2128_s15 = smov 3  ;;  %v2001_v21 = vsel %vm1083_vm1, %v1999_v15, %v1996_v20  ;;  %s2131_s24 = smov 12  ;;  %2678 = vrot.lane.b32.xlu0 %v2677_v11, %s2694_s21 }
  0x82   :  { %v1891_v51 = vsel %vm1088_vm2, %v1889_v4, %v1886_v48  ;;  %v2017_v19 = vld [vmem:[#allocation1 + $0x89] ss:$16 sm:%s2016_s0]   ;;  %v2129_v28 = vld [vmem:[#allocation1 + $0x10d] ss:$16 sm:%s2128_s15]   ;;  %s2136_s7 = smov 48  ;;  %s2151_s8 = smov 3 }
  0x83   :  { %v2657_v22 = vpack.i.bf16 %v1891_v51, %v1868_v16  ;;  %v2022_v24 = vld [vmem:[#allocation1 + $0x89] ss:$16 sm:%s2021_s27]   ;;  %v2019_v23 = vsel %vm1078_vm0, %v2017_v19, %v2014_v17  ;;  %v2132_v27 = vld [vmem:[#allocation1 + $0x10d] ss:$16 sm:%s2131_s24]   ;;  %s2154_s9 = smov 12  ;;  %s2159_s18 = smov 48 }
  0x84   :  { %v2004_v52 = vld [vmem:[#allocation1 + $0x9] ss:$16 sm:%s2003_s6]   ;;  %v2024_v26 = vsel %vm1083_vm1, %v2022_v24, %v2019_v23  ;;  %v2152_v29 = vld [vmem:[#allocation1 + $0x18d] ss:$16 sm:%s2151_s8]   ;;  %v2134_v35 = vsel %vm1078_vm0, %v2132_v27, %v2129_v28  ;;  %s2141_s26 = smov 192  ;;  %s2164_s20 = smov 192 }
  0x85   :  { %v2027_v25 = vld [vmem:[#allocation1 + $0x89] ss:$16 sm:%s2026_s28]   ;;  %2658 = vrot.lane.b32.xlu2 %v2657_v22, %s2694_s21  ;;  %v2006_v30 = vsel %vm1088_vm2, %v2004_v52, %v2001_v21  ;;  %v2155_v32 = vld [vmem:[#allocation1 + $0x18d] ss:$16 sm:%s2154_s9]   ;;  %v968_v47 = vld [vmem:[#allocation1 + $0x20] ss:$4 sm:$0xff]  }
  0x86   :  { %v2029_v53 = vsel %vm1088_vm2, %v2027_v25, %v2024_v26  ;;  %v2137_v37 = vld [vmem:[#allocation1 + $0x10d] ss:$16 sm:%s2136_s7]   ;;  %v2157_v38 = vsel %vm1078_vm0, %v2155_v32, %v2152_v29  ;;  %964 = vst.msk [vmem:[#allocation0] ss:$8 sm:$0xf] %vm963_vm3, %v962_v44   ;;  %s3527_s19 = sld [smem:[#allocation14_spill]] }
  0x87   :  { %v2160_v41 = vld [vmem:[#allocation1 + $0x18d] ss:$16 sm:%s2159_s18]   ;;  %v2672_v57 = vpack.i.bf16 %v2029_v53, %v2006_v30  ;;  %v2139_v42 = vsel %vm1083_vm1, %v2137_v37, %v2134_v35  ;;  %966 = vst.msk [vmem:[#allocation0 - $0x1f] ss:$8 sm:$0xf0] %vm963_vm3, %v962_v44  }
  0x88   :  { %v2142_v43 = vld [vmem:[#allocation1 + $0x10d] ss:$16 sm:%s2141_s26]   ;;  %v2162_v58 = vsel %vm1083_vm1, %v2160_v41, %v2157_v38  ;;  %v975_v0 = vld [vmem:[#allocation1 + $0x40] ss:$4 sm:$0xff]  }
  0x89   :  { %v2165_v45 = vld [vmem:[#allocation1 + $0x18d] ss:$16 sm:%s2164_s20]   ;;  %v2144_v46 = vsel %vm1088_vm2, %v2142_v43, %v2139_v42  ;;  %971 = vst.msk [vmem:[#allocation0 + $0x2] ss:$8 sm:$0xf] %vm963_vm3, %v968_v47  }
  0x8a   :  { %v2167_v62 = vsel %vm1088_vm2, %v2165_v45, %v2162_v58  ;;  %973 = vst.msk [vmem:[#allocation0 - $0x1d] ss:$8 sm:$0xf0] %vm963_vm3, %v968_v47   ;;  %v982_v1 = vld [vmem:[#allocation1 + $0x60] ss:$4 sm:$0xff]  }
  0x8b   :  { %v2687_v49 = vpack.i.bf16 %v2167_v62, %v2144_v46  ;;  %978 = vst.msk [vmem:[#allocation0 + $0x4] ss:$8 sm:$0xf] %vm963_vm3, %v975_v0   ;;  %v989_v50 = vld [vmem:[#allocation1 + $0x80] ss:$4 sm:$0xff]  }
  0x8c   :  { %980 = vst.msk [vmem:[#allocation0 - $0x1b] ss:$8 sm:$0xf0] %vm963_vm3, %v975_v0   ;;  %v996_v54 = vld [vmem:[#allocation1 + $0xa0] ss:$4 sm:$0xff]  }
  0x8d   :  { %2673 = vrot.lane.b32.xlu2 %v2672_v57, %s2694_s21  ;;  %985 = vst.msk [vmem:[#allocation0 + $0x6] ss:$8 sm:$0xf] %vm963_vm3, %v982_v1   ;;  %v1003_v2 = vld [vmem:[#allocation1 + $0xc0] ss:$4 sm:$0xff]  }
  0x8e   :  { %987 = vst.msk [vmem:[#allocation0 - $0x19] ss:$8 sm:$0xf0] %vm963_vm3, %v982_v1   ;;  %v1010_v31 = vld [vmem:[#allocation1 + $0xe0] ss:$4 sm:$0xff]  }
  0x8f   :  { %992 = vst.msk [vmem:[#allocation0 + $0x20] ss:$8 sm:$0xf] %vm963_vm3, %v989_v50   ;;  %v1017_v33 = vld [vmem:[#allocation1 + $0x100] ss:$4 sm:$0xff]  }
  0x90   :  { %994 = vst.msk [vmem:[#allocation0 + $0x1] ss:$8 sm:$0xf0] %vm963_vm3, %v989_v50   ;;  %v1024_v34 = vld [vmem:[#allocation1 + $0x120] ss:$4 sm:$0xff]  }
  0x91   :  { %999 = vst.msk [vmem:[#allocation0 + $0x22] ss:$8 sm:$0xf] %vm963_vm3, %v996_v54   ;;  %v1031_v59 = vld [vmem:[#allocation1 + $0x140] ss:$4 sm:$0xff]  }
  0x92   :  { %1001 = vst.msk [vmem:[#allocation0 + $0x3] ss:$8 sm:$0xf0] %vm963_vm3, %v996_v54   ;;  %v1038_v14 = vld [vmem:[#allocation1 + $0x160] ss:$4 sm:$0xff]  }
  0x93   :  { %1006 = vst.msk [vmem:[#allocation0 + $0x24] ss:$8 sm:$0xf] %vm963_vm3, %v1003_v2   ;;  %v1045_v61 = vld [vmem:[#allocation1 + $0x180] ss:$4 sm:$0xff]  }
  0x94   :  { %v2584_v9 = vpop.permute.xlu1 %2583  ;;  %v2574_v39 = vpop.permute.xlu0 %2573  ;;  %1008 = vst.msk [vmem:[#allocation0 + $0x5] ss:$8 sm:$0xf0] %vm963_vm3, %v1003_v2   ;;  %v1052_v40 = vld [vmem:[#allocation1 + $0x1a0] ss:$4 sm:$0xff]  }
  0x95   :  { %2688 = vrot.lane.b32.xlu2 %v2687_v49, %s2694_s21  ;;  %v2575_v55 = vunpack.i.l.bf16 %v2574_v39  ;;  %v2576_v8 = vunpack.i.h.bf16 %v2574_v39  ;;  %v2585_v56 = vunpack.i.l.bf16 %v2584_v9  ;;  %1013 = vst.msk [vmem:[#allocation0 + $0x26] ss:$8 sm:$0xf] %vm963_vm3, %v1010_v31   ;;  %v2586_v10 = vunpack.i.h.bf16 %v2584_v9  ;;  %v1059_v16 = vld [vmem:[#allocation1 + $0x1c0] ss:$4 sm:$0xff]  }
  0x96   :  { %1015 = vst.msk [vmem:[#allocation0 + $0x7] ss:$8 sm:$0xf0] %vm963_vm3, %v1010_v31   ;;  %v1066_v18 = vld [vmem:[#allocation1 + $0x1e0] ss:$4 sm:$0xff]  }
  0x97   :  { %1093 = vst.msk [vmem:[#allocation0] sm:$0xff] %vm1092_vm4, %v2575_v55  }
  0x98   :  { %1116 = vst.msk [vmem:[#allocation0 + $0x20] sm:$0xff] %vm1092_vm4, %v2576_v8  }
  0x99   :  { %1185 = vst.msk [vmem:[#allocation0 + $0x8] sm:$0xff] %vm1092_vm4, %v2585_v56  }
  0x9a   :  { %1208 = vst.msk [vmem:[#allocation0 + $0x28] sm:$0xff] %vm1092_vm4, %v2586_v10  }
  0x9b   :  { %1020 = vst.msk [vmem:[#allocation0 + $0x40] ss:$8 sm:$0xf] %vm963_vm3, %v1017_v33  }
  0x9c   :  { %1022 = vst.msk [vmem:[#allocation0 + $0x21] ss:$8 sm:$0xf0] %vm963_vm3, %v1017_v33  }
  0x9d   :  { %1027 = vst.msk [vmem:[#allocation0 + $0x42] ss:$8 sm:$0xf] %vm963_vm3, %v1024_v34  }
  0x9e   :  { %1029 = vst.msk [vmem:[#allocation0 + $0x23] ss:$8 sm:$0xf0] %vm963_vm3, %v1024_v34  }
  0x9f   :  { %1034 = vst.msk [vmem:[#allocation0 + $0x44] ss:$8 sm:$0xf] %vm963_vm3, %v1031_v59  }
  0xa0   :  { %1036 = vst.msk [vmem:[#allocation0 + $0x25] ss:$8 sm:$0xf0] %vm963_vm3, %v1031_v59  }
  0xa1   :  { %1041 = vst.msk [vmem:[#allocation0 + $0x46] ss:$8 sm:$0xf] %vm963_vm3, %v1038_v14  }
  0xa2   :  { %1043 = vst.msk [vmem:[#allocation0 + $0x27] ss:$8 sm:$0xf0] %vm963_vm3, %v1038_v14  }
  0xa3   :  { %1048 = vst.msk [vmem:[#allocation0 + $0x60] ss:$8 sm:$0xf] %vm963_vm3, %v1045_v61  }
  0xa4   :  { %1050 = vst.msk [vmem:[#allocation0 + $0x41] ss:$8 sm:$0xf0] %vm963_vm3, %v1045_v61  }
  0xa5   :  { %v2589_v6 = vpop.permute.xlu1 %2588  ;;  %v2579_v7 = vpop.permute.xlu0 %2578  ;;  %1055 = vst.msk [vmem:[#allocation0 + $0x62] ss:$8 sm:$0xf] %vm963_vm3, %v1052_v40  }
  0xa6   :  { %1057 = vst.msk [vmem:[#allocation0 + $0x43] ss:$8 sm:$0xf0] %vm963_vm3, %v1052_v40   ;;  %v2590_v4 = vunpack.i.l.bf16 %v2589_v6  ;;  %v2591_v5 = vunpack.i.h.bf16 %v2589_v6  ;;  %v2580_v11 = vunpack.i.l.bf16 %v2579_v7  ;;  %v2581_v48 = vunpack.i.h.bf16 %v2579_v7 }
  0xa7   :  { %1062 = vst.msk [vmem:[#allocation0 + $0x64] ss:$8 sm:$0xf] %vm963_vm3, %v1059_v16  }
  0xa8   :  { %1064 = vst.msk [vmem:[#allocation0 + $0x45] ss:$8 sm:$0xf0] %vm963_vm3, %v1059_v16  }
  0xa9   :  { %1069 = vst.msk [vmem:[#allocation0 + $0x66] ss:$8 sm:$0xf] %vm963_vm3, %v1066_v18  }
  0xaa   :  { %1071 = vst.msk [vmem:[#allocation0 + $0x47] ss:$8 sm:$0xf0] %vm963_vm3, %v1066_v18  }
  0xab   :  { %1231 = vst.msk [vmem:[#allocation0 + $0x48] sm:$0xff] %vm1092_vm4, %v2590_v4  }
  0xac   :  { %1254 = vst.msk [vmem:[#allocation0 + $0x68] sm:$0xff] %vm1092_vm4, %v2591_v5  }
  0xad   :  { %1139 = vst.msk [vmem:[#allocation0 + $0x40] sm:$0xff] %vm1092_vm4, %v2580_v11  }
  0xae   :  { %1162 = vst.msk [vmem:[#allocation0 + $0x60] sm:$0xff] %vm1092_vm4, %v2581_v48  }
  0xb3   :  { %v2594_v12 = vpop.permute.xlu2 %2593 }
  0xb4   :  { %v2596_v60 = vunpack.i.h.bf16 %v2594_v12  ;;  %v2595_v36 = vunpack.i.l.bf16 %v2594_v12 }
  0xb6   :  { %1277 = vst.msk [vmem:[#allocation0 + $0x10] sm:$0xff] %vm1092_vm4, %v2595_v36  }
  0xb7   :  { %1300 = vst.msk [vmem:[#allocation0 + $0x30] sm:$0xff] %vm1092_vm4, %v2596_v60   ;;  %v2609_v63 = vpop.permute.xlu1 %2608 }
  0xb8   :  { %v2610_v19 = vunpack.i.l.bf16 %v2609_v63  ;;  %v2611_v24 = vunpack.i.h.bf16 %v2609_v63 }
  0xba   :  { %1415 = vst.msk [vmem:[#allocation0 + $0x58] sm:$0xff] %vm1092_vm4, %v2610_v19  }
  0xbb   :  { %v2599_v3 = vpop.permute.xlu2 %2598  ;;  %1438 = vst.msk [vmem:[#allocation0 + $0x78] sm:$0xff] %vm1092_vm4, %v2611_v24  }
  0xbc   :  { %v2600_v51 = vunpack.i.l.bf16 %v2599_v3  ;;  %v2601_v22 = vunpack.i.h.bf16 %v2599_v3 }
  0xbe   :  { %1323 = vst.msk [vmem:[#allocation0 + $0x50] sm:$0xff] %vm1092_vm4, %v2600_v51  }
  0xbf   :  { %v2624_v13 = vpop.permute.xlu1 %2623  ;;  %1346 = vst.msk [vmem:[#allocation0 + $0x70] sm:$0xff] %vm1092_vm4, %v2601_v22  }
  0xc0   :  { %v2626_v21 = vunpack.i.h.bf16 %v2624_v13  ;;  %v2625_v30 = vunpack.i.l.bf16 %v2624_v13 }
  0xc2   :  { %1575 = vst.msk [vmem:[#allocation0 + $0x28] sm:$0xff] %vm1459_vm5, %v2626_v21  }
  0xc3   :  { %v2614_v15 = vpop.permute.xlu2 %2613  ;;  %1552 = vst.msk [vmem:[#allocation0 + $0x8] sm:$0xff] %vm1459_vm5, %v2625_v30  }
  0xc4   :  { %v2616_v20 = vunpack.i.h.bf16 %v2614_v15  ;;  %v2615_v17 = vunpack.i.l.bf16 %v2614_v15 }
  0xc6   :  { %1483 = vst.msk [vmem:[#allocation0 + $0x20] sm:$0xff] %vm1459_vm5, %v2616_v20  }
  0xc7   :  { %1460 = vst.msk [vmem:[#allocation0] sm:$0xff] %vm1459_vm5, %v2615_v17   ;;  %v2639_v52 = vpop.permute.xlu1 %2638  ;;  %v2604_v23 = vpop.permute.xlu0 %2603 }
  0xc8   :  { %v2606_v25 = vunpack.i.h.bf16 %v2604_v23  ;;  %v2605_v26 = vunpack.i.l.bf16 %v2604_v23  ;;  %v2640_v53 = vunpack.i.l.bf16 %v2639_v52  ;;  %v2641_v32 = vunpack.i.h.bf16 %v2639_v52 }
  0xca   :  { %1369 = vst.msk [vmem:[#allocation0 + $0x18] sm:$0xff] %vm1092_vm4, %v2605_v26  }
  0xcb   :  { %v2629_v28 = vpop.permute.xlu2 %2628  ;;  %1392 = vst.msk [vmem:[#allocation0 + $0x38] sm:$0xff] %vm1092_vm4, %v2606_v25  }
  0xcc   :  { %v2631_v27 = vunpack.i.h.bf16 %v2629_v28  ;;  %v2630_v29 = vunpack.i.l.bf16 %v2629_v28  ;;  %1690 = vst.msk [vmem:[#allocation0 + $0x50] sm:$0xff] %vm1459_vm5, %v2640_v53  }
  0xcd   :  { %1713 = vst.msk [vmem:[#allocation0 + $0x70] sm:$0xff] %vm1459_vm5, %v2641_v32  }
  0xce   :  { %1598 = vst.msk [vmem:[#allocation0 + $0x48] sm:$0xff] %vm1459_vm5, %v2630_v29  }
  0xcf   :  { %1621 = vst.msk [vmem:[#allocation0 + $0x68] sm:$0xff] %vm1459_vm5, %v2631_v27   ;;  %v2619_v35 = vpop.permute.xlu0 %2618 }
  0xd0   :  { %v2621_v38 = vunpack.i.h.bf16 %v2619_v35  ;;  %v2620_v41 = vunpack.i.l.bf16 %v2619_v35 }
  0xd2   :  { %v2654_v37 = vpop.permute.xlu1 %2653  ;;  %1506 = vst.msk [vmem:[#allocation0 + $0x40] sm:$0xff] %vm1459_vm5, %v2620_v41  }
  0xd3   :  { %v2644_v57 = vpop.permute.xlu2 %2643  ;;  %v2656_v58 = vunpack.i.h.bf16 %v2654_v37  ;;  %1529 = vst.msk [vmem:[#allocation0 + $0x60] sm:$0xff] %vm1459_vm5, %v2621_v38   ;;  %v2655_v45 = vunpack.i.l.bf16 %v2654_v37 }
  0xd4   :  { %v2646_v42 = vunpack.i.h.bf16 %v2644_v57  ;;  %v2645_v43 = vunpack.i.l.bf16 %v2644_v57 }
  0xd5   :  { %1850 = vst.msk [vmem:[#allocation0 + $0x20] sm:$0xff] %vm1826_vm6, %v2656_v58  }
  0xd6   :  { %1736 = vst.msk [vmem:[#allocation0 + $0x18] sm:$0xff] %vm1459_vm5, %v2645_v43  }
  0xd7   :  { %1759 = vst.msk [vmem:[#allocation0 + $0x38] sm:$0xff] %vm1459_vm5, %v2646_v42   ;;  %v2634_v46 = vpop.permute.xlu0 %2633 }
  0xd8   :  { %1827 = vst.msk [vmem:[#allocation0] sm:$0xff] %vm1826_vm6, %v2655_v45   ;;  %v2636_v62 = vunpack.i.h.bf16 %v2634_v46  ;;  %v2635_v49 = vunpack.i.l.bf16 %v2634_v46 }
  0xda   :  { %1667 = vst.msk [vmem:[#allocation0 + $0x30] sm:$0xff] %vm1459_vm5, %v2636_v62  }
  0xdb   :  { %1644 = vst.msk [vmem:[#allocation0 + $0x10] sm:$0xff] %vm1459_vm5, %v2635_v49  }
  0xdc   :  { %v2202_v5 = vld [vmem:[#allocation0 + $0x20] sm:$0xff] }
  0xdf   :  { %v2659_v9 = vpop.permute.xlu2 %2658  ;;  %v2649_v50 = vpop.permute.xlu0 %2648  ;;  %v2175_v48 = vld [vmem:[#allocation0] sm:$0xff] }
  0xe0   :  { %v2661_v39 = vunpack.i.h.bf16 %v2659_v9  ;;  %v2660_v44 = vunpack.i.l.bf16 %v2659_v9  ;;  %v2669_v47 = vpop.permute.xlu1 %2668  ;;  %v2651_v54 = vunpack.i.h.bf16 %v2649_v50  ;;  %v2650_v2 = vunpack.i.l.bf16 %v2649_v50 }
  0xe1   :  { %v2671_v0 = vunpack.i.h.bf16 %v2669_v47  ;;  %v2670_v1 = vunpack.i.l.bf16 %v2669_v47 }
  0xe2   :  { %1873 = vst.msk [vmem:[#allocation0 + $0x40] sm:$0xff] %vm1826_vm6, %v2660_v44  }
  0xe3   :  { %1896 = vst.msk [vmem:[#allocation0 + $0x60] sm:$0xff] %vm1826_vm6, %v2661_v39  }
  0xe4   :  { %1965 = vst.msk [vmem:[#allocation0 + $0x48] sm:$0xff] %vm1826_vm6, %v2670_v1  }
  0xe5   :  { %1988 = vst.msk [vmem:[#allocation0 + $0x68] sm:$0xff] %vm1826_vm6, %v2671_v0  }
  0xe6   :  { %1782 = vst.msk [vmem:[#allocation0 + $0x58] sm:$0xff] %vm1459_vm5, %v2650_v2  }
  0xe7   :  { %v2674_v6 = vpop.permute.xlu2 %2673  ;;  %1805 = vst.msk [vmem:[#allocation0 + $0x78] sm:$0xff] %vm1459_vm5, %v2651_v54  }
  0xe8   :  { %v2676_v7 = vunpack.i.h.bf16 %v2674_v6  ;;  %v2675_v31 = vunpack.i.l.bf16 %v2674_v6  ;;  %v2664_v59 = vpop.permute.xlu0 %2663 }
  0xe9   :  { %v2230_v55 = vld [vmem:[#allocation0 + $0x40] sm:$0xff]  ;;  %v2666_v60 = vunpack.i.h.bf16 %v2664_v59  ;;  %v2665_v36 = vunpack.i.l.bf16 %v2664_v59 }
  0xea   :  { %2011 = vst.msk [vmem:[#allocation0 + $0x10] sm:$0xff] %vm1826_vm6, %v2675_v31   ;;  %v2258_v56 = vld [vmem:[#allocation0 + $0x60] sm:$0xff] }
  0xeb   :  { %2034 = vst.msk [vmem:[#allocation0 + $0x30] sm:$0xff] %vm1826_vm6, %v2676_v7   ;;  %v2237_v8 = vld [vmem:[#allocation0 + $0x48] sm:$0xff] }
  0xec   :  { %v2514_v10 = vpack.c.bf16 %v2237_v8, %v2230_v55  ;;  %v2265_v33 = vld [vmem:[#allocation0 + $0x68] sm:$0xff]  ;;  %1942 = vst.msk [vmem:[#allocation0 + $0x28] sm:$0xff] %vm1826_vm6, %v2666_v60  }
  0xed   :  { %v2524_v34 = vpack.c.bf16 %v2265_v33, %v2258_v56  ;;  %1919 = vst.msk [vmem:[#allocation0 + $0x8] sm:$0xff] %vm1826_vm6, %v2665_v36  }
  0xee   :  { %v2684_v12 = vpop.permute.xlu1 %2683  ;;  %2565 = vst [vmem:[%s3527_s19 + $0x20] sm:$0xff] %v2514_v10  }
  0xef   :  { %v2689_v14 = vpop.permute.xlu2 %2688  ;;  %2567 = vst [vmem:[%s3527_s19 + $0x30] sm:$0xff] %v2524_v34   ;;  %v2685_v40 = vunpack.i.l.bf16 %v2684_v12  ;;  %v2686_v3 = vunpack.i.h.bf16 %v2684_v12 }
  0xf0   :  { %v2691_v61 = vunpack.i.h.bf16 %v2689_v14  ;;  %v2690_v63 = vunpack.i.l.bf16 %v2689_v14 }
  0xf1   :  { %2103 = vst.msk [vmem:[#allocation0 + $0x18] sm:$0xff] %vm1826_vm6, %v2685_v40   ;;  %v2188_v20 = vld [vmem:[#allocation0 + $0x10] sm:$0xff] }
  0xf2   :  { %2149 = vst.msk [vmem:[#allocation0 + $0x58] sm:$0xff] %vm1826_vm6, %v2690_v63   ;;  %v2216_v22 = vld [vmem:[#allocation0 + $0x30] sm:$0xff] }
  0xf3   :  { %2172 = vst.msk [vmem:[#allocation0 + $0x78] sm:$0xff] %vm1826_vm6, %v2691_v61   ;;  %v2679_v16 = vpop.permute.xlu0 %2678  ;;  %v2209_v11 = vld [vmem:[#allocation0 + $0x28] sm:$0xff] }
  0xf4   :  { %2126 = vst.msk [vmem:[#allocation0 + $0x38] sm:$0xff] %vm1826_vm6, %v2686_v3   ;;  %v2681_v18 = vunpack.i.h.bf16 %v2679_v16  ;;  %v2680_v4 = vunpack.i.l.bf16 %v2679_v16  ;;  %v2181_v13 = vld [vmem:[#allocation0 + $0x8] sm:$0xff]  ;;  %v2504_v15 = vpack.c.bf16 %v2209_v11, %v2202_v5 }
  0xf5   :  { %v2494_v51 = vpack.c.bf16 %v2181_v13, %v2175_v48 }
  0xf6   :  { %2057 = vst.msk [vmem:[#allocation0 + $0x50] sm:$0xff] %vm1826_vm6, %v2680_v4  }
  0xf7   :  { %2080 = vst.msk [vmem:[#allocation0 + $0x70] sm:$0xff] %vm1826_vm6, %v2681_v18  }
  0xf8   :  { %2563 = vst [vmem:[%s3527_s19 + $0x10] sm:$0xff] %v2504_v15   ;;  %v2195_v17 = vld [vmem:[#allocation0 + $0x18] sm:$0xff] }
  0xf9   :  { %2495 = vst [vmem:[%s3527_s19] sm:$0xff] %v2494_v51   ;;  %v2499_v19 = vpack.c.bf16 %v2195_v17, %v2188_v20  ;;  %v2251_v21 = vld [vmem:[#allocation0 + $0x58] sm:$0xff] }
  0xfa   :  { %v2279_v23 = vld [vmem:[#allocation0 + $0x78] sm:$0xff] }
  0xfb   :  { %v2223_v24 = vld [vmem:[#allocation0 + $0x38] sm:$0xff]  ;;  %2562 = vst [vmem:[%s3527_s19 + $0x8] sm:$0xff] %v2499_v19  }
  0xfc   :  { %v2509_v52 = vpack.c.bf16 %v2223_v24, %v2216_v22 }
  0xfd   :  { %v2244_v25 = vld [vmem:[#allocation0 + $0x50] sm:$0xff] }
  0xfe   :  { %2564 = vst [vmem:[%s3527_s19 + $0x18] sm:$0xff] %v2509_v52   ;;  %v2272_v26 = vld [vmem:[#allocation0 + $0x70] sm:$0xff]  ;;  %v2519_v28 = vpack.c.bf16 %v2251_v21, %v2244_v25 }
  0xff   :  { %v2529_v27 = vpack.c.bf16 %v2279_v23, %v2272_v26 }
 0x100   :  { %2566 = vst [vmem:[%s3527_s19 + $0x28] sm:$0xff] %v2519_v28  }
 0x101   :  { %2568 = vst [vmem:[%s3527_s19 + $0x38] sm:$0xff] %v2529_v27  }

// kernel: se_block_forward.1
= control target key start
LH: loop header
LB: loop body
LE: loop exit
PB: predicated region body
PF: predicated region fallthrough
CT: control target
= control target key end

     0   :  { %vm158_vm0 = vcmask 1041409   ;;  %vm259_vm1 = vcmask 1041408   ;;  %vm255_vm2 = vcmask 15360   ;;  %s942_s1 = inlined_call_operand.vmem [shape: f32[512,2], index: 1, kind: input, shape index: {}]   ;;  %s943_s0 = inlined_call_operand.vmem [shape: f32[2,16,512], index: 0, kind: input, shape index: {}]   ;;  %s944_s2 = inlined_call_operand.vmem [shape: f32[2,512], index: 2, kind: input, shape index: {}]   ;;  %s945_s3 = inlined_call_operand.vmem [shape: f32[2,16,512], index: 3, kind: output, shape index: {}]  }
   0x1   :  { %v133_v0 = vld [vmem:[%s942_s1 + $0x178] sm:$0xff]  ;;  %v132_v1 = vld [vmem:[%s942_s1 + $0x170] sm:$0xff]  ;;  %v131_v5 = vld [vmem:[%s942_s1 + $0x168] sm:$0xff] }
   0x2   :  { %v149_v2 = vld [vmem:[%s942_s1 + $0x1f8] sm:$0xff]  ;;  %207 = vmatpush.msra.mxu2 %v133_v0  ;;  %v148_v6 = vld [vmem:[%s942_s1 + $0x1f0] sm:$0xff]  ;;  %v147_v9 = vld [vmem:[%s942_s1 + $0x1e8] sm:$0xff] }
   0x3   :  { %227 = vmatpush.msra.mxu3 %v149_v2  ;;  %v101_v3 = vld [vmem:[%s942_s1 + $0x78] sm:$0xff]  ;;  %v100_v7 = vld [vmem:[%s942_s1 + $0x70] sm:$0xff]  ;;  %v99_v10 = vld [vmem:[%s942_s1 + $0x68] sm:$0xff] }
   0x4   :  { %v117_v4 = vld [vmem:[%s942_s1 + $0xf8] sm:$0xff]  ;;  %167 = vmatpush.msra.mxu0 %v101_v3  ;;  %v116_v8 = vld [vmem:[%s942_s1 + $0xf0] sm:$0xff]  ;;  %208 = vmatpush.msra.mxu2 %v132_v1  ;;  %v130_v11 = vld [vmem:[%s942_s1 + $0x160] sm:$0xff] }
   0x5   :  { %187 = vmatpush.msra.mxu1 %v117_v4  ;;  %228 = vmatpush.msra.mxu3 %v148_v6  ;;  %v115_v12 = vld [vmem:[%s942_s1 + $0xe8] sm:$0xff]  ;;  %v146_v13 = vld [vmem:[%s942_s1 + $0x1e0] sm:$0xff]  ;;  %v129_v16 = vld [vmem:[%s942_s1 + $0x158] sm:$0xff] }
   0x6   :  { %168 = vmatpush.msra.mxu0 %v100_v7  ;;  %209 = vmatpush.msra.mxu2 %v131_v5  ;;  %v98_v14 = vld [vmem:[%s942_s1 + $0x60] sm:$0xff]  ;;  %v145_v17 = vld [vmem:[%s942_s1 + $0x1d8] sm:$0xff]  ;;  %v128_v20 = vld [vmem:[%s942_s1 + $0x150] sm:$0xff] }
   0x7   :  { %188 = vmatpush.msra.mxu1 %v116_v8  ;;  %229 = vmatpush.msra.mxu3 %v147_v9  ;;  %v114_v15 = vld [vmem:[%s942_s1 + $0xe0] sm:$0xff]  ;;  %v97_v18 = vld [vmem:[%s942_s1 + $0x58] sm:$0xff]  ;;  %v144_v21 = vld [vmem:[%s942_s1 + $0x1d0] sm:$0xff] }
   0x8   :  { %169 = vmatpush.msra.mxu0 %v99_v10  ;;  %210 = vmatpush.msra.mxu2 %v130_v11  ;;  %v113_v19 = vld [vmem:[%s942_s1 + $0xd8] sm:$0xff]  ;;  %v96_v22 = vld [vmem:[%s942_s1 + $0x50] sm:$0xff]  ;;  %v127_v24 = vld [vmem:[%s942_s1 + $0x148] sm:$0xff] }
   0x9   :  { %189 = vmatpush.msra.mxu1 %v115_v12  ;;  %230 = vmatpush.msra.mxu3 %v146_v13  ;;  %v112_v23 = vld [vmem:[%s942_s1 + $0xd0] sm:$0xff]  ;;  %v143_v25 = vld [vmem:[%s942_s1 + $0x1c8] sm:$0xff]  ;;  %v126_v28 = vld [vmem:[%s942_s1 + $0x140] sm:$0xff] }
   0xa   :  { %170 = vmatpush.msra.mxu0 %v98_v14  ;;  %211 = vmatpush.msra.mxu2 %v129_v16  ;;  %v95_v26 = vld [vmem:[%s942_s1 + $0x48] sm:$0xff]  ;;  %v142_v29 = vld [vmem:[%s942_s1 + $0x1c0] sm:$0xff]  ;;  %v125_v32 = vld [vmem:[%s942_s1 + $0x138] sm:$0xff] }
   0xb   :  { %190 = vmatpush.msra.mxu1 %v114_v15  ;;  %231 = vmatpush.msra.mxu3 %v145_v17  ;;  %v111_v27 = vld [vmem:[%s942_s1 + $0xc8] sm:$0xff]  ;;  %v94_v30 = vld [vmem:[%s942_s1 + $0x40] sm:$0xff]  ;;  %v141_v33 = vld [vmem:[%s942_s1 + $0x1b8] sm:$0xff] }
   0xc   :  { %171 = vmatpush.msra.mxu0 %v97_v18  ;;  %212 = vmatpush.msra.mxu2 %v128_v20  ;;  %v110_v31 = vld [vmem:[%s942_s1 + $0xc0] sm:$0xff]  ;;  %v93_v34 = vld [vmem:[%s942_s1 + $0x38] sm:$0xff]  ;;  %v124_v36 = vld [vmem:[%s942_s1 + $0x130] sm:$0xff] }
   0xd   :  { %191 = vmatpush.msra.mxu1 %v113_v19  ;;  %232 = vmatpush.msra.mxu3 %v144_v21  ;;  %v109_v35 = vld [vmem:[%s942_s1 + $0xb8] sm:$0xff]  ;;  %v123_v37 = vld [vmem:[%s942_s1 + $0x128] sm:$0xff]  ;;  %v140_v38 = vld [vmem:[%s942_s1 + $0x1b0] sm:$0xff] }
   0xe   :  { %172 = vmatpush.msra.mxu0 %v96_v22  ;;  %213 = vmatpush.msra.mxu2 %v127_v24  ;;  %v92_v39 = vld [vmem:[%s942_s1 + $0x30] sm:$0xff]  ;;  %v139_v41 = vld [vmem:[%s942_s1 + $0x1a8] sm:$0xff]  ;;  %v122_v42 = vld [vmem:[%s942_s1 + $0x120] sm:$0xff] }
   0xf   :  { %192 = vmatpush.msra.mxu1 %v112_v23  ;;  %233 = vmatpush.msra.mxu3 %v143_v25  ;;  %v108_v40 = vld [vmem:[%s942_s1 + $0xb0] sm:$0xff]  ;;  %v91_v43 = vld [vmem:[%s942_s1 + $0x28] sm:$0xff]  ;;  %v138_v45 = vld [vmem:[%s942_s1 + $0x1a0] sm:$0xff] }
  0x10   :  { %173 = vmatpush.msra.mxu0 %v95_v26  ;;  %214 = vmatpush.msra.mxu2 %v126_v28  ;;  %v107_v44 = vld [vmem:[%s942_s1 + $0xa8] sm:$0xff]  ;;  %v90_v46 = vld [vmem:[%s942_s1 + $0x20] sm:$0xff]  ;;  %v689_v48 = vld [vmem:[%s943_s0 + $0x10] sm:$0xff] }
  0x11   :  { %193 = vmatpush.msra.mxu1 %v111_v27  ;;  %234 = vmatpush.msra.mxu3 %v142_v29  ;;  %v106_v47 = vld [vmem:[%s942_s1 + $0xa0] sm:$0xff]  ;;  %v121_v49 = vld [vmem:[%s942_s1 + $0x118] sm:$0xff]  ;;  %v697_v50 = vld [vmem:[%s943_s0 + $0x30] sm:$0xff] }
  0x12   :  { %174 = vmatpush.msra.mxu0 %v94_v30  ;;  %215 = vmatpush.msra.mxu2 %v125_v32  ;;  %v702_v51 = vld [vmem:[%s943_s0 + $0x50] sm:$0xff]  ;;  %v137_v53 = vld [vmem:[%s942_s1 + $0x198] sm:$0xff]  ;;  %v44_v56 = vadd.f32 %v697_v50, %v689_v48  ;;  %v119_v5 = vld [vmem:[%s942_s1 + $0x108] sm:$0xff] }
  0x13   :  { %194 = vmatpush.msra.mxu1 %v110_v31  ;;  %235 = vmatpush.msra.mxu3 %v141_v33  ;;  %v707_v52 = vld [vmem:[%s943_s0 + $0x70] sm:$0xff]  ;;  %v89_v54 = vld [vmem:[%s942_s1 + $0x18] sm:$0xff]  ;;  %v764_v7 = vld [vmem:[%s943_s0] sm:$0xff] }
  0x14   :  { %175 = vmatpush.msra.mxu0 %v93_v34  ;;  %216 = vmatpush.msra.mxu2 %v124_v36  ;;  %v105_v55 = vld [vmem:[%s942_s1 + $0x98] sm:$0xff]  ;;  %v72_v57 = vadd.f32 %v707_v52, %v702_v51  ;;  %v120_v58 = vld [vmem:[%s942_s1 + $0x110] sm:$0xff]  ;;  %v45_v1 = vrot.slane %v44_v56, 4  ;;  %v769_v8 = vld [vmem:[%s943_s0 + $0x20] sm:$0xff] }
  0x15   :  { %195 = vmatpush.msra.mxu1 %v109_v35  ;;  %236 = vmatpush.msra.mxu3 %v140_v38  ;;  %v136_v59 = vld [vmem:[%s942_s1 + $0x190] sm:$0xff]  ;;  %v731_v60 = vld [vmem:[%s943_s0 + $0x18] sm:$0xff]  ;;  %v774_v9 = vld [vmem:[%s943_s0 + $0x40] sm:$0xff]  ;;  %v30_v14 = vadd.f32 %v769_v8, %v764_v7 }
  0x16   :  { %176 = vmatpush.msra.mxu0 %v92_v39  ;;  %217 = vmatpush.msra.mxu2 %v123_v37  ;;  %v736_v61 = vld [vmem:[%s943_s0 + $0x38] sm:$0xff]  ;;  %v88_v63 = vld [vmem:[%s942_s1 + $0x10] sm:$0xff]  ;;  %v73_v2 = vrot.slane %v72_v57, 4  ;;  %v46_v10 = vadd.f32 %v45_v1, %v44_v56  ;;  %v779_v13 = vld [vmem:[%s943_s0 + $0x60] sm:$0xff] }
  0x17   :  { %196 = vmatpush.msra.mxu1 %v108_v40  ;;  %237 = vmatpush.msra.mxu3 %v139_v41  ;;  %v741_v62 = vld [vmem:[%s943_s0 + $0x58] sm:$0xff]  ;;  %v104_v0 = vld [vmem:[%s942_s1 + $0x90] sm:$0xff]  ;;  %v51_v4 = vadd.f32 %v736_v61, %v731_v60  ;;  %v786_v15 = vld [vmem:[%s943_s0 + $0x8] sm:$0xff]  ;;  %v58_v19 = vadd.f32 %v779_v13, %v774_v9  ;;  %v31_v28 = vrot.slane %v30_v14, 4 }
  0x18   :  { %177 = vmatpush.msra.mxu0 %v91_v43  ;;  %218 = vmatpush.msra.mxu2 %v122_v42  ;;  %v752_v3 = vld [vmem:[%s943_s0 + $0x78] sm:$0xff]  ;;  %v74_v11 = vadd.f32 %v73_v2, %v72_v57  ;;  %v791_v16 = vld [vmem:[%s943_s0 + $0x28] sm:$0xff]  ;;  %v47_v23 = vrot.slane %v46_v10, 2  ;;  %v118_v29 = vld [vmem:[%s942_s1 + $0x100] sm:$0xff] }
  0x19   :  { %197 = vmatpush.msra.mxu1 %v107_v44  ;;  %238 = vmatpush.msra.mxu3 %v138_v45  ;;  %v79_v6 = vadd.f32 %v752_v3, %v741_v62  ;;  %v52_v12 = vrot.slane %v51_v4, 4  ;;  %v135_v17 = vld [vmem:[%s942_s1 + $0x188] sm:$0xff]  ;;  %v37_v22 = vadd.f32 %v791_v16, %v786_v15  ;;  %v134_v30 = vld [vmem:[%s942_s1 + $0x180] sm:$0xff]  ;;  %v59_v32 = vrot.slane %v58_v19, 4 }
  0x1a   :  { %178 = vmatpush.msra.mxu0 %v90_v46  ;;  %219 = vmatpush.msra.mxu2 %v121_v49  ;;  %v801_v20 = vld [vmem:[%s943_s0 + $0x48] sm:$0xff]  ;;  %v75_v24 = vrot.slane %v74_v11, 2  ;;  %v48_v35 = vadd.f32 %v47_v23, %v46_v10  ;;  %v86_v38 = vld [vmem:[%s942_s1] sm:$0xff]  ;;  %v32_v40 = vadd.f32 %v31_v28, %v30_v14 }
  0x1b   :  { %198 = vmatpush.msra.mxu1 %v106_v47  ;;  %239 = vmatpush.msra.mxu3 %v137_v53  ;;  %v80_v18 = vrot.slane %v79_v6, 4  ;;  %v806_v21 = vld [vmem:[%s943_s0 + $0x68] sm:$0xff]  ;;  %v53_v27 = vadd.f32 %v52_v12, %v51_v4  ;;  %v38_v33 = vrot.slane %v37_v22, 4  ;;  %v102_v39 = vld [vmem:[%s942_s1 + $0x80] sm:$0xff]  ;;  %v60_v42 = vadd.f32 %v59_v32, %v58_v19 }
  0x1c   :  { %179 = vmatpush.msra.mxu0 %v89_v54  ;;  %220 = vmatpush.msra.mxu2 %v120_v58  ;;  %v87_v25 = vld [vmem:[%s942_s1 + $0x8] sm:$0xff]  ;;  %v65_v34 = vadd.f32 %v806_v21, %v801_v20  ;;  %v76_v36 = vadd.f32 %v75_v24, %v74_v11  ;;  %v49_v45 = vrot.slane %v48_v35, 1  ;;  %v33_v49 = vrot.slane %v32_v40, 2  ;;  %v248_v28 = vld [vmem:[%s944_s2] sm:$0xff] }
  0x1d   :  { %199 = vmatpush.msra.mxu1 %v105_v55  ;;  %240 = vmatpush.msra.mxu3 %v136_v59  ;;  %v103_v26 = vld [vmem:[%s942_s1 + $0x88] sm:$0xff]  ;;  %v81_v31 = vadd.f32 %v80_v18, %v79_v6  ;;  %v54_v37 = vrot.slane %v53_v27, 2  ;;  %v39_v43 = vadd.f32 %v38_v33, %v37_v22  ;;  %v61_v54 = vrot.slane %v60_v42, 2  ;;  %250 = vst [vmem:[#allocation1] ss:$4 sm:$0xff] %v248_v28 }
  0x1e   :  { %180 = vmatpush.msra.mxu0 %v88_v63  ;;  %221 = vmatpush.msra.mxu2 %v119_v5  ;;  %v66_v44 = vrot.slane %v65_v34, 4  ;;  %v77_v46 = vrot.slane %v76_v36, 1  ;;  %v50_v57 = vadd.f32 %v49_v45, %v48_v35  ;;  %v34_v63 = vadd.f32 %v33_v49, %v32_v40 }
  0x1f   :  { %200 = vmatpush.msra.mxu1 %v104_v0  ;;  %241 = vmatpush.msra.mxu3 %v135_v17  ;;  %v82_v41 = vrot.slane %v81_v31, 2  ;;  %v55_v47 = vadd.f32 %v54_v37, %v53_v27  ;;  %v40_v55 = vrot.slane %v39_v43, 2  ;;  %v62_v1 = vadd.f32 %v61_v54, %v60_v42 }
  0x20   :  { %181 = vmatpush.msra.mxu0 %v87_v25  ;;  %222 = vmatpush.msra.mxu2 %v118_v29  ;;  %v67_v56 = vadd.f32 %v66_v44, %v65_v34  ;;  %v78_v58 = vadd.f32 %v77_v46, %v76_v36  ;;  %v35_v10 = vrot.slane %v34_v63, 1 }
  0x21   :  { %201 = vmatpush.msra.mxu1 %v103_v26  ;;  %242 = vmatpush.msra.mxu3 %v134_v30  ;;  %v83_v53 = vadd.f32 %v82_v41, %v81_v31  ;;  %v56_v59 = vrot.slane %v55_v47, 1  ;;  %v41_v2 = vadd.f32 %v40_v55, %v39_v43  ;;  %v63_v12 = vrot.slane %v62_v1, 1 }
  0x22   :  { %182 = vmatpush.msra.mxu0 %v86_v38  ;;  %v68_v4 = vrot.slane %v67_v56, 2  ;;  %v161_v5 = vsel %vm158_vm0, %v78_v58, %v50_v57  ;;  %v36_v18 = vadd.f32 %v35_v10, %v34_v63 }
  0x23   :  { %202 = vmatpush.msra.mxu1 %v102_v39  ;;  %v84_v0 = vrot.slane %v83_v53, 1  ;;  %v57_v6 = vadd.f32 %v56_v59, %v55_v47  ;;  %223 = vmatmul.f32.vlgmr.msra.gmra.mxu2 %v161_v5  ;;  %v42_v14 = vrot.slane %v41_v2, 1  ;;  %v64_v22 = vadd.f32 %v63_v12, %v62_v1 }
  0x24   :  { %v69_v17 = vadd.f32 %v68_v4, %v67_v56  ;;  %v253_v29 = vld.sshfl [vmem:[#allocation1 + $0x10] sm:$0xff pattern:$0x73625140]  ;;  %v254_v30 = vld.sshfl [vmem:[#allocation1 + $0x18] sm:$0xff pattern:$0x73625140] }
  0x25   :  { %v85_v11 = vadd.f32 %v84_v0, %v83_v53  ;;  %v43_v23 = vadd.f32 %v42_v14, %v41_v2  ;;  %v159_v25 = vsel %vm158_vm0, %v64_v22, %v36_v18  ;;  %498 = vmatpush.msk.msrb.mxu2 %vm259_vm1, %v253_v29  ;;  %500 = vmatpush.msk.msrb.mxu3 %vm259_vm1, %v254_v30  ;;  %v252_v31 = vld.sshfl [vmem:[#allocation1 + $0x8] sm:$0xff pattern:$0x73625140]  ;;  %v251_v32 = vld.sshfl [vmem:[#allocation1] sm:$0xff pattern:$0x73625140] }
  0x26   :  { %v70_v24 = vrot.slane %v69_v17, 1  ;;  %183 = vmatmul.f32.vlgmr.msra.gmra.mxu0 %v159_v25  ;;  %496 = vmatpush.msk.msrb.mxu1 %vm259_vm1, %v252_v31 }
  0x27   :  { %v162_v19 = vsel %vm158_vm0, %v85_v11, %v57_v6  ;;  %494 = vmatpush.msk.msrb.mxu0 %vm259_vm1, %v251_v32 }
  0x28   :  { %243 = vmatmul.f32.vlgmr.msra.gmra.mxu3 %v162_v19  ;;  %v71_v26 = vadd.f32 %v70_v24, %v69_v17 }
  0x2a   :  { %v160_v27 = vsel %vm158_vm0, %v71_v26, %v43_v23 }
  0x2b   :  { %203 = vmatmul.f32.vlgmr.msra.gmra.mxu1 %v160_v27 }
  0xa3   :  { %v184_v33 = vpop.f32.mrf.mxu0 }
  0xa6   :  { %v224_v35 = vpop.f32.mrf.mxu2 }
  0xa8   :  { %v204_v34 = vpop.f32.mrf.mxu1 }
  0xa9   :  { %v205_v36 = vadd.f32 %v204_v34, %v184_v33 }
  0xab   :  { %v244_v37 = vpop.f32.mrf.mxu3  ;;  %v225_v38 = vadd.f32 %v224_v35, %v205_v36 }
  0xad   :  { %v245_v39 = vadd.f32 %v244_v37, %v225_v38 }
  0xaf   :  { %v247_v40 = vmax.f32 %v245_v39, 0.0 }
  0xb1   :  { %495 = vmatmul.msk.f32.vlgmr.msrb.gmra.mxu0 %vm255_vm2, %v247_v40  ;;  %497 = vmatmul.msk.f32.vlgmr.msrb.gmra.mxu1 %vm255_vm2, %v247_v40 }
  0xb2   :  { %499 = vmatmul.msk.f32.vlgmr.msrb.gmra.mxu2 %vm255_vm2, %v247_v40  ;;  %501 = vmatmul.msk.f32.vlgmr.msrb.gmra.mxu3 %vm255_vm2, %v247_v40  ;;  %vm431_vm2 = vcmask 1040384  }
 0x12e   :  { %v285_v41 = vpop.f32.mrf.mxu0  ;;  %v305_v42 = vpop.f32.mrf.mxu1 }
 0x12f   :  { %v502_v43 = vmul.f32 -1.442695, %v285_v41  ;;  %v503_v44 = vmul.f32 -1.442695, %v305_v42 }
 0x131   :  { %506 = vpow2.f32 %v502_v43 }
 0x132   :  { %508 = vpow2.f32 %v503_v44 }
 0x135   :  { %v325_v45 = vpop.f32.mrf.mxu2  ;;  %v345_v46 = vpop.f32.mrf.mxu3 }
 0x136   :  { %v504_v47 = vmul.f32 -1.442695, %v325_v45  ;;  %v505_v49 = vmul.f32 -1.442695, %v345_v46 }
 0x137   :  { %v507_v53 = vpop.eup %506 }
 0x138   :  { %v509_v54 = vpop.eup %508  ;;  %v841_v55 = vadd.f32 1.0, %v507_v53  ;;  %510 = vpow2.f32 %v504_v47 }
 0x139   :  { %v361_v56 = vadd.f32 1.0, %v509_v54  ;;  %512 = vpow2.f32 %v505_v49 }
 0x13a   :  { %514 = vrcp.f32 %v841_v55  ;;  %vm369_vm4 = vweird.f32 %v841_v55  ;;  %v373_v38 = vand.u32 2147483647, %v841_v55  ;;  %v375_v39 = vand.u32 2147483648, %v841_v55 }
 0x13b   :  { %516 = vrcp.f32 %v361_v56  ;;  %v388_v12 = vand.u32 2147483647, %v361_v56  ;;  %v390_v14 = vand.u32 2147483648, %v361_v56  ;;  %vm384_vm5 = vweird.f32 %v361_v56 }
 0x13d   :  { %vm854_vm7 = vcmp.eq.f32.partialorder %v388_v12, 8.507059e+37  ;;  %v391_v27 = vor.u32 1.1754944e-38, %v390_v14 }
 0x13e   :  { %v511_v57 = vpop.eup %510 }
 0x13f   :  { %v513_v58 = vpop.eup %512  ;;  %v362_v59 = vadd.f32 1.0, %v511_v57 }
 0x140   :  { %v844_v63 = vpop.eup %514  ;;  %v363_v0 = vadd.f32 1.0, %v513_v58 }
 0x141   :  { %v517_v1 = vpop.eup %516  ;;  %518 = vrcp.f32 %v362_v59  ;;  %v365_v2 = vmul.f32 %v844_v63, %v841_v55  ;;  %v403_v28 = vand.u32 2147483647, %v362_v59  ;;  %v405_v29 = vand.u32 2147483648, %v362_v59 }
 0x142   :  { %v380_v4 = vmul.f32 %v517_v1, %v361_v56  ;;  %520 = vrcp.f32 %v363_v0  ;;  %vm385_vm3 = vweird.f32 %v517_v1  ;;  %vm370_vm9 = vweird.f32 %v844_v63 }
 0x143   :  { %v366_v6 = vsub.f32 1.0, %v365_v2  ;;  %vm850_vm6 = vmor %vm384_vm5, %vm385_vm3  ;;  %vm399_vm10 = vweird.f32 %v362_v59  ;;  %v418_v33 = vand.u32 2147483647, %v363_v0  ;;  %v420_v34 = vand.u32 2147483648, %v363_v0 }
 0x144   :  { %v381_v5 = vsub.f32 1.0, %v380_v4  ;;  %v406_v41 = vor.u32 1.1754944e-38, %v405_v29  ;;  %vm868_vm13 = vmor %vm369_vm4, %vm370_vm9  ;;  %vm404_vm14 = vcmp.eq.f32.partialorder %v403_v28, 8.507059e+37  ;;  %vm414_vm15 = vweird.f32 %v363_v0 }
 0x145   :  { %v367_v22 = vmul.f32 %v844_v63, %v366_v6  ;;  %vm419_vm5 = vcmp.eq.f32.partialorder %v418_v33, 8.507059e+37  ;;  %v421_v46 = vor.u32 1.1754944e-38, %v420_v34  ;;  %v376_v55 = vor.u32 1.1754944e-38, %v375_v39 }
 0x146   :  { %v382_v10 = vmul.f32 %v517_v1, %v381_v5  ;;  %vm433_vm4 = vcmask 1042434  }
 0x147   :  { %v519_v11 = vpop.eup %518  ;;  %v368_v35 = vadd.f32 %v844_v63, %v367_v22 }
 0x148   :  { %v383_v17 = vadd.f32 %v517_v1, %v382_v10  ;;  %v395_v18 = vmul.f32 %v519_v11, %v362_v59  ;;  %v521_v19 = vpop.eup %520  ;;  %vm400_vm8 = vweird.f32 %v519_v11 }
 0x149   :  { %v410_v24 = vmul.f32 %v521_v19, %v363_v0  ;;  %vm415_vm11 = vweird.f32 %v521_v19  ;;  %vm401_vm12 = vmor %vm399_vm10, %vm400_vm8  ;;  %v372_v47 = vsel %vm868_vm13, %v844_v63, %v368_v35  ;;  %vm439_vm8 = vcmask 1042433  }
 0x14a   :  { %v396_v23 = vsub.f32 1.0, %v395_v18  ;;  %v387_v30 = vsel %vm850_vm6, %v517_v1, %v383_v17  ;;  %vm416_vm3 = vmor %vm414_vm15, %vm415_vm11  ;;  %vm437_vm6 = vcmask 1043459  }
 0x14b   :  { %v411_v32 = vsub.f32 1.0, %v410_v24  ;;  %v392_v40 = vsel %vm854_vm7, %v391_v27, %v387_v30  ;;  %vm374_vm7 = vcmp.eq.f32.partialorder %v373_v38, 8.507059e+37 }
 0x14c   :  { %v397_v31 = vmul.f32 %v519_v11, %v396_v23  ;;  %v428_v49 = vrot.slane %v392_v40, 7  ;;  %v377_v58 = vsel %vm374_vm7, %v376_v55, %v372_v47 }
 0x14d   :  { %v412_v37 = vmul.f32 %v521_v19, %v411_v32 }
 0x14e   :  { %v398_v36 = vadd.f32 %v519_v11, %v397_v31  ;;  %v432_v59 = vsel %vm431_vm2, %v377_v58, %v428_v49  ;;  %v436_v0 = vsel %vm158_vm0, %v377_v58, %v428_v49 }
 0x14f   :  { %v413_v44 = vadd.f32 %v521_v19, %v412_v37 }
 0x150   :  { %v402_v43 = vsel %vm401_vm12, %v519_v11, %v398_v36 }
 0x151   :  { %v407_v45 = vsel %vm404_vm14, %v406_v41, %v402_v43  ;;  %v417_v54 = vsel %vm416_vm3, %v521_v19, %v413_v44 }
 0x152   :  { %v429_v53 = vrot.slane %v407_v45, 6  ;;  %v422_v56 = vsel %vm419_vm5, %v421_v46, %v417_v54 }
 0x153   :  { %v430_v57 = vrot.slane %v422_v56, 5 }
 0x155   :  { %v434_v1 = vsel %vm433_vm4, %v429_v53, %v430_v57  ;;  %v438_v2 = vsel %vm437_vm6, %v429_v53, %v430_v57 }
 0x156   :  { %v435_v4 = vsel %vm259_vm1, %v432_v59, %v434_v1  ;;  %v440_v63 = vsel %vm439_vm8, %v436_v0, %v438_v2 }
 0x157   :  { %v442_v5 = vperm.slane %v435_v4, 0  ;;  %v443_v6 = vperm.slane %v435_v4, 1  ;;  %v444_v10 = vperm.slane %v435_v4, 2  ;;  %v441_v11 = vrot.slane %v440_v63, 1 }
 0x158   :  { %v445_v12 = vperm.slane %v435_v4, 3 }
 0x159   :  { %v458_v14 = vmul.f32 %v442_v5, %v764_v7  ;;  %v459_v17 = vmul.f32 %v443_v6, %v786_v15  ;;  %v460_v18 = vmul.f32 %v444_v10, %v689_v48  ;;  %v446_v22 = vperm.slane %v441_v11, 0 }
 0x15a   :  { %v461_v19 = vmul.f32 %v445_v12, %v731_v60  ;;  %v462_v23 = vmul.f32 %v442_v5, %v769_v8  ;;  %v447_v24 = vperm.slane %v441_v11, 1  ;;  %v463_v25 = vmul.f32 %v443_v6, %v791_v16 }
 0x15b   :  { %474 = vst [vmem:[%s945_s3] sm:$0xff] %v458_v14  ;;  %v448_v7 = vperm.slane %v441_v11, 2  ;;  %v464_v15 = vmul.f32 %v444_v10, %v697_v50  ;;  %v449_v48 = vperm.slane %v441_v11, 3  ;;  %v465_v60 = vmul.f32 %v445_v12, %v736_v61 }
 0x15c   :  { %475 = vst [vmem:[%s945_s3 + $0x8] sm:$0xff] %v459_v17  ;;  %v466_v8 = vmul.f32 %v446_v22, %v774_v9  ;;  %v467_v16 = vmul.f32 %v447_v24, %v801_v20  ;;  %v470_v9 = vmul.f32 %v446_v22, %v779_v13  ;;  %v471_v20 = vmul.f32 %v447_v24, %v806_v21 }
 0x15d   :  { %476 = vst [vmem:[%s945_s3 + $0x10] sm:$0xff] %v460_v18  ;;  %v468_v50 = vmul.f32 %v448_v7, %v702_v51  ;;  %v469_v61 = vmul.f32 %v449_v48, %v741_v62  ;;  %v472_v51 = vmul.f32 %v448_v7, %v707_v52  ;;  %v473_v62 = vmul.f32 %v449_v48, %v752_v3 }
 0x15e   :  { %477 = vst [vmem:[%s945_s3 + $0x18] sm:$0xff] %v461_v19 }
 0x15f   :  { %478 = vst [vmem:[%s945_s3 + $0x20] sm:$0xff] %v462_v23 }
 0x160   :  { %479 = vst [vmem:[%s945_s3 + $0x28] sm:$0xff] %v463_v25 }
 0x161   :  { %480 = vst [vmem:[%s945_s3 + $0x30] sm:$0xff] %v464_v15 }
 0x162   :  { %481 = vst [vmem:[%s945_s3 + $0x38] sm:$0xff] %v465_v60 }
 0x163   :  { %482 = vst [vmem:[%s945_s3 + $0x40] sm:$0xff] %v466_v8 }
 0x164   :  { %483 = vst [vmem:[%s945_s3 + $0x48] sm:$0xff] %v467_v16 }
 0x165   :  { %484 = vst [vmem:[%s945_s3 + $0x50] sm:$0xff] %v468_v50 }
 0x166   :  { %485 = vst [vmem:[%s945_s3 + $0x58] sm:$0xff] %v469_v61 }
 0x167   :  { %486 = vst [vmem:[%s945_s3 + $0x60] sm:$0xff] %v470_v9 }
 0x168   :  { %487 = vst [vmem:[%s945_s3 + $0x68] sm:$0xff] %v471_v20 }
 0x169   :  { %488 = vst [vmem:[%s945_s3 + $0x70] sm:$0xff] %v472_v51 }
 0x16a   :  { %489 = vst [vmem:[%s945_s3 + $0x78] sm:$0xff] %v473_v62 }

</bundles_post_ra>
